<compile_context>
chip_gen: v6e
topology: v6e:2x2x1
jax: 0.10.0
libtpu: 0.0.40
codegen_flags: <defaults>
</compile_context>

<pallas_src>
import functools

import jax
import jax.numpy as jnp
from jax.experimental import pallas as pl
from jax.experimental.pallas import tpu as pltpu


# ---------------- kernel 1: conv + ReLU + fused input-gate projections --------- #

def _conv_gx_kernel(x_ref, w_ref, b_ref, wg1_ref, bg1_ref, wgs_ref, bgs_ref,
                    gx1_ref, gxs_ref, *, Ck, T, B, S):
    """Conv2d(1,hidC,(Ck,m)) + ReLU fused with both GRUs' input-gate projections.

    x_ref  : (P*B, m)        time-major slab (row p*B + b == x[b, p, :]); B is a
                             multiple of 8 so every k*B slide is sublane aligned.
    w_ref  : (Ck, m, hidC)   conv weight, w_ref[k, j, oc] = conv_w[oc, 0, k, j].
    b_ref  : (1, hidC)       conv bias.
    wg1_ref: (3, hidC, hidR) gate-major GRU1 input weights (W_ih^T per gate r,z,n).
    bg1_ref: (3, 1, hidR)    b_ih (+ b_hh folded for the r/z gates).
    wgs/bgs: same for the skip GRU (hidS).
    gx1_ref: (3, T*B, hidR)  precomputed GRU1 input gates.
    gxs_ref: (3, S*B, hidS)  precomputed skip-GRU input gates (last S time steps).
    """
    acc = jnp.dot(x_ref[0:T * B, :], w_ref[0], preferred_element_type=jnp.float32)
    for k in range(1, Ck):
        acc += jnp.dot(x_ref[k * B:(k + T) * B, :], w_ref[k],
                       preferred_element_type=jnp.float32)
    c = jnp.maximum(acc + b_ref[...], 0.0)                       # (T*B, hidC)
    c_tail = c[(T - S) * B:, :]                                  # (S*B, hidC), aligned
    for g in range(3):                                           # gates r, z, n
        gx1_ref[g] = (jnp.dot(c, wg1_ref[g], preferred_element_type=jnp.float32)
                      + bg1_ref[g])
        gxs_ref[g] = (jnp.dot(c_tail, wgs_ref[g], preferred_element_type=jnp.float32)
                      + bgs_ref[g])


def _gate_stack(w_ih, b_ih, b_hh, H):
    """Gate-major (3, I, H) input weights, with b_ih (+ b_hh for r/z) folded in."""
    w = jnp.stack([w_ih[0:H].T, w_ih[H:2 * H].T, w_ih[2 * H:3 * H].T], 0)
    b = jnp.stack([(b_ih[0:H] + b_hh[0:H]).reshape(1, H),
                   (b_ih[H:2 * H] + b_hh[H:2 * H]).reshape(1, H),
                   b_ih[2 * H:3 * H].reshape(1, H)], 0)
    return w.astype(jnp.float32), b.astype(jnp.float32)


def conv_and_input_gates(x, params, Ck, hidC, hidR, hidS, pt, skip):
    """Returns (gx1, gxs, Bp): precomputed input gates for GRU1 and GRUskip."""
    B, P, m = x.shape
    T = P - Ck + 1
    S = pt * skip
    Bp = ((B + 7) // 8) * 8            # sublane-align the per-timestep row blocks
    if Bp != B:
        x = jnp.pad(x, ((0, Bp - B), (0, 0), (0, 0)))
    x_flat = jnp.transpose(x, (1, 0, 2)).reshape(P * Bp, m).astype(jnp.float32)
    w_r = jnp.transpose(params["conv_w"].reshape(hidC, Ck, m), (1, 2, 0)).astype(jnp.float32)
    b2 = params["conv_b"].reshape(1, hidC).astype(jnp.float32)
    wg1, bg1 = _gate_stack(params["gru1_w_ih"], params["gru1_b_ih"],
                           params["gru1_b_hh"], hidR)
    wgs, bgs = _gate_stack(params["grus_w_ih"], params["grus_b_ih"],
                           params["grus_b_hh"], hidS)
    # TODO(synk): at production batch sizes the conv should be tiled over batch
    # with a 'parallel' leading grid axis (v7x 64 MiB VMEM / 2 TensorCores).
    gx1, gxs = pl.pallas_call(
        functools.partial(_conv_gx_kernel, Ck=Ck, T=T, B=Bp, S=S),
        out_shape=(jax.ShapeDtypeStruct((3, T * Bp, hidR), jnp.float32),
                   jax.ShapeDtypeStruct((3, S * Bp, hidS), jnp.float32)),
        grid=(1,),
        in_specs=[pl.BlockSpec((P * Bp, m), lambda i: (0, 0)),
                  pl.BlockSpec((Ck, m, hidC), lambda i: (0, 0, 0)),
                  pl.BlockSpec((1, hidC), lambda i: (0, 0)),
                  pl.BlockSpec((3, hidC, hidR), lambda i: (0, 0, 0)),
                  pl.BlockSpec((3, 1, hidR), lambda i: (0, 0, 0)),
                  pl.BlockSpec((3, hidC, hidS), lambda i: (0, 0, 0)),
                  pl.BlockSpec((3, 1, hidS), lambda i: (0, 0, 0))],
        out_specs=(pl.BlockSpec((3, T * Bp, hidR), lambda i: (0, 0, 0)),
                   pl.BlockSpec((3, S * Bp, hidS), lambda i: (0, 0, 0))),
        compiler_params=pltpu.CompilerParams(
            dimension_semantics=("arbitrary",),
            vmem_limit_bytes=32 * 1024 * 1024),
    )(x_flat, w_r, b2, wg1, bg1, wgs, bgs)
    return gx1, gxs, Bp


# --------------------------- kernel 2: GRU recurrence --------------------------- #

def _gru_kernel(gxr_ref, gxz_ref, gxn_ref, whr_ref, whz_ref, whn_ref, bhn_ref,
                h_ref, *, T, B, H):
    """PyTorch-convention GRU; input gates are fully precomputed (biases folded).

    gx*_ref: (T, B, H) precomputed per-gate input projections.
    wh*_ref: (H, H)    per-gate hidden weights (W_hh^T slices) -> no lane slicing.
    bhn_ref: (1, H)    hidden bias of the n gate (must stay inside r * (.)).
    h_ref  : (B, H)    final hidden state output.
    """
    whr = whr_ref[...]
    whz = whz_ref[...]
    whn = whn_ref[...]
    bhn = jnp.broadcast_to(bhn_ref[...], (B, H))     # hoisted out of the time loop

    def step(t, h):
        ghr = jnp.dot(h, whr, preferred_element_type=jnp.float32)
        ghz = jnp.dot(h, whz, preferred_element_type=jnp.float32)
        ghn = jnp.dot(h, whn, preferred_element_type=jnp.float32)
        r = jax.nn.sigmoid(gxr_ref[t] + ghr)
        z = jax.nn.sigmoid(gxz_ref[t] + ghz)
        n = jnp.tanh(gxn_ref[t] + r * (ghn + bhn))
        return (1.0 - z) * n + z * h

    h_ref[...] = jax.lax.fori_loop(0, T, step, jnp.zeros((B, H), jnp.float32))


def gru_from_gates(gx, w_hh, b_hh):
    """gx: (3, T, Bb, H) precomputed input gates; returns final hidden (Bb, H)."""
    _, T, Bb, H = gx.shape
    wh = jnp.stack([w_hh[0:H].T, w_hh[H:2 * H].T, w_hh[2 * H:3 * H].T], 0).astype(jnp.float32)
    bhn = b_hh[2 * H:3 * H].reshape(1, H).astype(jnp.float32)
    seq_spec = pl.BlockSpec((T, Bb, H), lambda i: (0, 0, 0))
    mat_spec = pl.BlockSpec((H, H), lambda i: (0, 0))
    return pl.pallas_call(
        functools.partial(_gru_kernel, T=T, B=Bb, H=H),
        out_shape=jax.ShapeDtypeStruct((Bb, H), jnp.float32),
        grid=(1,),
        in_specs=[seq_spec, seq_spec, seq_spec, mat_spec, mat_spec, mat_spec,
                  pl.BlockSpec((1, H), lambda i: (0, 0))],
        out_specs=pl.BlockSpec((Bb, H), lambda i: (0, 0)),
        compiler_params=pltpu.CompilerParams(dimension_semantics=("arbitrary",)),
    )(gx[0], gx[1], gx[2], wh[0], wh[1], wh[2], bhn)


# ------------------- kernel 3: linear1 + highway + sigmoid ---------------------- #

def _tail_kernel(r_ref, s_ref, w1a_ref, w1b_ref, b_ref, xz_ref, whw_ref, o_ref, *, hw):
    """sigmoid( r @ W1a + s @ W1b + (b1 + hw_b) + sum_k hw_w[k] * x[:, P-hw+k, :] )."""
    res = jnp.dot(r_ref[...], w1a_ref[...], preferred_element_type=jnp.float32)
    res = res + jnp.dot(s_ref[...], w1b_ref[...], preferred_element_type=jnp.float32)
    z = whw_ref[0] * xz_ref[0]                       # lane axis = m (dense VPU work)
    for k in range(1, hw):
        z = z + whw_ref[k] * xz_ref[k]
    o_ref[...] = jax.nn.sigmoid(res + b_ref[...] + z)


def tail_fused(r, hs2, lin_w, lin_b, x_tail, hw_w, hw_b):
    """r: (B, hidR), hs2: (B, skip*hidS), x_tail: (hw, B, m).  Returns (B, m)."""
    B, hidR = r.shape
    _, S = hs2.shape
    m = lin_w.shape[0]
    hw = x_tail.shape[0]
    w1a = lin_w[:, :hidR].T.astype(jnp.float32)               # (hidR, m)
    w1b = lin_w[:, hidR:].T.astype(jnp.float32)               # (S, m)
    b_tot = (lin_b + hw_b[0]).reshape(1, m).astype(jnp.float32)
    whw = hw_w.reshape(hw).astype(jnp.float32)                # scalar weights in SMEM
    return pl.pallas_call(
        functools.partial(_tail_kernel, hw=hw),
        out_shape=jax.ShapeDtypeStruct((B, m), jnp.float32),
        grid=(1,),
        in_specs=[pl.BlockSpec((B, hidR), lambda i: (0, 0)),
                  pl.BlockSpec((B, S), lambda i: (0, 0)),
                  pl.BlockSpec((hidR, m), lambda i: (0, 0)),
                  pl.BlockSpec((S, m), lambda i: (0, 0)),
                  pl.BlockSpec((1, m), lambda i: (0, 0)),
                  pl.BlockSpec((hw, B, m), lambda i: (0, 0, 0)),
                  pl.BlockSpec(memory_space=pltpu.MemorySpace.SMEM)],
        out_specs=pl.BlockSpec((B, m), lambda i: (0, 0)),
    )(r.astype(jnp.float32), hs2.astype(jnp.float32), w1a, w1b, b_tot,
      x_tail.astype(jnp.float32), whw)


# --------------------------------- Forward pass --------------------------------- #

def lstnet_skip_forward(x, params, cfg):
    B, P, m = x.shape
    Ck, hidC, hidR, hidS = cfg["Ck"], cfg["hidC"], cfg["hidR"], cfg["hidS"]
    skip, hw = cfg["skip"], cfg["hw"]
    T = P - Ck + 1
    pt = (P - Ck) // skip
    S = pt * skip

    # conv + ReLU + both GRUs' input-gate projections (one kernel).
    gx1, gxs, Bp = conv_and_input_gates(x, params, Ck, hidC, hidR, hidS, pt, skip)
    # TODO(synk): nn.Dropout layers are treated as identity (inference mode).

    # GRU1 over the full time axis; only the final hidden state is used.
    gx1 = gx1.reshape(3, T, Bp, hidR)
    r_full = gru_from_gates(gx1, params["gru1_w_hh"], params["gru1_b_hh"])   # (Bp, hidR)

    # Skip-recurrent branch: sequence length pt, batch Bp*skip (row = b*skip + sk).
    gxs = gxs.reshape(3, pt, skip, Bp, hidS)
    gxs = jnp.transpose(gxs, (0, 1, 3, 2, 4)).reshape(3, pt, Bp * skip, hidS)
    hs_full = gru_from_gates(gxs, params["grus_w_hh"], params["grus_b_hh"])  # (Bp*skip, hidS)

    r = r_full[:B]
    hs2 = hs_full.reshape(Bp, skip * hidS)[:B]

    # Fused linear1 + highway + sigmoid (output_fun == 'sigmoid').
    x_tail = jnp.transpose(x[:, P - hw:, :], (1, 0, 2))                      # (hw, B, m)
    return tail_fused(r, hs2, params["lin1_w"], params["lin1_b"],
                      x_tail, params["hw_w"], params["hw_b"])


# ----------------------------- Pure-JAX reference ------------------------------- #

def _ref_forward(x, params, cfg):
    B, P, m = x.shape
    Ck, hidC, hidR, hidS = cfg["Ck"], cfg["hidC"], cfg["hidR"], cfg["hidS"]
    skip, hw = cfg["skip"], cfg["hw"]
    T = P - Ck + 1
    pt = (P - Ck) // skip

    w = params["conv_w"].reshape(hidC, Ck * m)
    patches = jnp.stack([x[:, t:t + Ck, :].reshape(B, Ck * m) for t in range(T)], 1)
    c = jax.nn.relu(patches @ w.T + params["conv_b"])                   # (B, T, hidC)

    def gru(seq, w_ih, w_hh, b_ih, b_hh):
        H = w_hh.shape[1]

        def step(h, xt):
            gx = xt @ w_ih.T + b_ih
            gh = h @ w_hh.T + b_hh
            rg = jax.nn.sigmoid(gx[:, :H] + gh[:, :H])
            zg = jax.nn.sigmoid(gx[:, H:2 * H] + gh[:, H:2 * H])
            ng = jnp.tanh(gx[:, 2 * H:] + rg * gh[:, 2 * H:])
            return (1.0 - zg) * ng + zg * h, None

        h0 = jnp.zeros((seq.shape[1], H), jnp.float32)
        hT, _ = jax.lax.scan(step, h0, seq)
        return hT

    r = gru(jnp.transpose(c, (1, 0, 2)), params["gru1_w_ih"], params["gru1_w_hh"],
            params["gru1_b_ih"], params["gru1_b_hh"])
    ctail = c[:, T - pt * skip:, :].reshape(B, pt, skip, hidC)
    s = jnp.transpose(ctail, (1, 0, 2, 3)).reshape(pt, B * skip, hidC)
    hs = gru(s, params["grus_w_ih"], params["grus_w_hh"],
             params["grus_b_ih"], params["grus_b_hh"]).reshape(B, skip * hidS)
    rc = jnp.concatenate([r, hs], 1)
    res = rc @ params["lin1_w"].T + params["lin1_b"]
    z = jnp.transpose(x[:, P - hw:, :], (0, 2, 1)).reshape(B * m, hw)
    z = z @ params["hw_w"].T + params["hw_b"]
    return jax.nn.sigmoid(res + z.reshape(B, m))


# ------------------------------------ Driver ------------------------------------ #

if __name__ == "__main__":
    key = jax.random.PRNGKey(0)
    B, P, m = 2, 16, 8
    hidC, hidR, hidS, Ck, skip, hw = 16, 16, 8, 4, 4, 4
    keys = jax.random.split(key, 16)

    def init(k, shape, scale=0.1):
        return jax.random.normal(k, shape, dtype=jnp.float32) * scale

    params = {
        "conv_w": init(keys[0], (hidC, 1, Ck, m)),
        "conv_b": init(keys[1], (hidC,)),
        "gru1_w_ih": init(keys[2], (3 * hidR, hidC)),
        "gru1_w_hh": init(keys[3], (3 * hidR, hidR)),
        "gru1_b_ih": init(keys[4], (3 * hidR,)),
        "gru1_b_hh": init(keys[5], (3 * hidR,)),
        "grus_w_ih": init(keys[6], (3 * hidS, hidC)),
        "grus_w_hh": init(keys[7], (3 * hidS, hidS)),
        "grus_b_ih": init(keys[8], (3 * hidS,)),
        "grus_b_hh": init(keys[9], (3 * hidS,)),
        "lin1_w": init(keys[10], (m, hidR + skip * hidS)),
        "lin1_b": init(keys[11], (m,)),
        "hw_w": init(keys[12], (1, hw)),
        "hw_b": init(keys[13], (1,)),
    }
    x = jax.random.normal(keys[14], (B, P, m), dtype=jnp.float32)
    cfg = dict(Ck=Ck, hidC=hidC, hidR=hidR, hidS=hidS, skip=skip, hw=hw)

    fwd = jax.jit(lambda xx, pp: lstnet_skip_forward(xx, pp, cfg))
    out = jax.block_until_ready(fwd(x, params))
    assert out.shape == (B, m), out.shape
    assert bool(jnp.all(jnp.isfinite(out)))

    ref = jax.block_until_ready(_ref_forward(x, params, cfg))
    max_err = float(jnp.max(jnp.abs(out - ref)))
    assert max_err < 5e-3, f"mismatch vs reference: {max_err}"

    print("KERNEL_OK")
</pallas_src>

<mosaic_0001>
module attributes {stable_mosaic.version = 11 : i64} {
  func.func @_conv_gx_kernel(%arg0: i32, %arg1: memref<128x8xf32, #tpu.memory_space<vmem>>, %arg2: memref<4x8x16xf32, #tpu.memory_space<vmem>>, %arg3: memref<1x16xf32, #tpu.memory_space<vmem>>, %arg4: memref<3x16x16xf32, #tpu.memory_space<vmem>>, %arg5: memref<3x1x16xf32, #tpu.memory_space<vmem>>, %arg6: memref<3x16x8xf32, #tpu.memory_space<vmem>>, %arg7: memref<3x1x8xf32, #tpu.memory_space<vmem>>, %arg8: memref<3x104x16xf32, #tpu.memory_space<vmem>>, %arg9: memref<3x96x8xf32, #tpu.memory_space<vmem>>) attributes {dimension_semantics = [#tpu.dimension_semantics<arbitrary>], iteration_bounds = array<i64: 1>, scalar_prefetch = 0 : i64, scratch_operands = 0 : i64, tpu.core_type = #tpu.core_type<tc>, window_params = [{pipeline_mode = #tpu.pipeline_mode<synchronous>, transform_indices = @transform_0, window_bounds = array<i64: 128, 8>}, {pipeline_mode = #tpu.pipeline_mode<synchronous>, transform_indices = @transform_1, window_bounds = array<i64: 4, 8, 16>}, {pipeline_mode = #tpu.pipeline_mode<synchronous>, transform_indices = @transform_2, window_bounds = array<i64: 1, 16>}, {pipeline_mode = #tpu.pipeline_mode<synchronous>, transform_indices = @transform_3, window_bounds = array<i64: 3, 16, 16>}, {pipeline_mode = #tpu.pipeline_mode<synchronous>, transform_indices = @transform_4, window_bounds = array<i64: 3, 1, 16>}, {pipeline_mode = #tpu.pipeline_mode<synchronous>, transform_indices = @transform_5, window_bounds = array<i64: 3, 16, 8>}, {pipeline_mode = #tpu.pipeline_mode<synchronous>, transform_indices = @transform_6, window_bounds = array<i64: 3, 1, 8>}, {pipeline_mode = #tpu.pipeline_mode<synchronous>, transform_indices = @transform_7, window_bounds = array<i64: 3, 104, 16>}, {pipeline_mode = #tpu.pipeline_mode<synchronous>, transform_indices = @transform_8, window_bounds = array<i64: 3, 96, 8>}]} {
    %c0 = arith.constant 0 : index
    %c0_0 = arith.constant 0 : index
    %0 = vector.load %arg1[%c0, %c0_0] : memref<128x8xf32, #tpu.memory_space<vmem>>, vector<104x8xf32>
    %c0_1 = arith.constant 0 : index
    %c0_2 = arith.constant 0 : index
    %c0_3 = arith.constant 0 : index
    %1 = vector.load %arg2[%c0_1, %c0_2, %c0_3] : memref<4x8x16xf32, #tpu.memory_space<vmem>>, vector<1x8x16xf32>
    %2 = vector.shape_cast %1 : vector<1x8x16xf32> to vector<8x16xf32>
    %cst = arith.constant dense<0.000000e+00> : vector<104x16xf32>
    %3 = tpu.matmul %0, %2, %cst {dimension_numbers = #tpu.dot_dimension_numbers<[1], [0], [0], [1], [0, 0, 1, 1], [], []>} : vector<104x8xf32>, vector<8x16xf32>, vector<104x16xf32> -> vector<104x16xf32>
    %c8 = arith.constant 8 : index
    %c0_4 = arith.constant 0 : index
    %4 = vector.load %arg1[%c8, %c0_4] : memref<128x8xf32, #tpu.memory_space<vmem>>, vector<104x8xf32>
    %c1 = arith.constant 1 : index
    %c0_5 = arith.constant 0 : index
    %c0_6 = arith.constant 0 : index
    %5 = vector.load %arg2[%c1, %c0_5, %c0_6] : memref<4x8x16xf32, #tpu.memory_space<vmem>>, vector<1x8x16xf32>
    %6 = vector.shape_cast %5 : vector<1x8x16xf32> to vector<8x16xf32>
    %cst_7 = arith.constant dense<0.000000e+00> : vector<104x16xf32>
    %7 = tpu.matmul %4, %6, %cst_7 {dimension_numbers = #tpu.dot_dimension_numbers<[1], [0], [0], [1], [0, 0, 1, 1], [], []>} : vector<104x8xf32>, vector<8x16xf32>, vector<104x16xf32> -> vector<104x16xf32>
    %8 = arith.addf %3, %7 : vector<104x16xf32>
    %c16 = arith.constant 16 : index
    %c0_8 = arith.constant 0 : index
    %9 = vector.load %arg1[%c16, %c0_8] : memref<128x8xf32, #tpu.memory_space<vmem>>, vector<104x8xf32>
    %c2 = arith.constant 2 : index
    %c0_9 = arith.constant 0 : index
    %c0_10 = arith.constant 0 : index
    %10 = vector.load %arg2[%c2, %c0_9, %c0_10] : memref<4x8x16xf32, #tpu.memory_space<vmem>>, vector<1x8x16xf32>
    %11 = vector.shape_cast %10 : vector<1x8x16xf32> to vector<8x16xf32>
    %cst_11 = arith.constant dense<0.000000e+00> : vector<104x16xf32>
    %12 = tpu.matmul %9, %11, %cst_11 {dimension_numbers = #tpu.dot_dimension_numbers<[1], [0], [0], [1], [0, 0, 1, 1], [], []>} : vector<104x8xf32>, vector<8x16xf32>, vector<104x16xf32> -> vector<104x16xf32>
    %13 = arith.addf %8, %12 : vector<104x16xf32>
    %c24 = arith.constant 24 : index
    %c0_12 = arith.constant 0 : index
    %14 = vector.load %arg1[%c24, %c0_12] : memref<128x8xf32, #tpu.memory_space<vmem>>, vector<104x8xf32>
    %c3 = arith.constant 3 : index
    %c0_13 = arith.constant 0 : index
    %c0_14 = arith.constant 0 : index
    %15 = vector.load %arg2[%c3, %c0_13, %c0_14] : memref<4x8x16xf32, #tpu.memory_space<vmem>>, vector<1x8x16xf32>
    %16 = vector.shape_cast %15 : vector<1x8x16xf32> to vector<8x16xf32>
    %cst_15 = arith.constant dense<0.000000e+00> : vector<104x16xf32>
    %17 = tpu.matmul %14, %16, %cst_15 {dimension_numbers = #tpu.dot_dimension_numbers<[1], [0], [0], [1], [0, 0, 1, 1], [], []>} : vector<104x8xf32>, vector<8x16xf32>, vector<104x16xf32> -> vector<104x16xf32>
    %18 = arith.addf %13, %17 : vector<104x16xf32>
    %c0_16 = arith.constant 0 : index
    %c0_17 = arith.constant 0 : index
    %19 = vector.load %arg3[%c0_16, %c0_17] : memref<1x16xf32, #tpu.memory_space<vmem>>, vector<1x16xf32>
    %20 = vector.broadcast %19 : vector<1x16xf32> to vector<104x16xf32>
    %21 = arith.addf %18, %20 : vector<104x16xf32>
    %cst_18 = arith.constant 0.000000e+00 : f32
    %22 = vector.broadcast %cst_18 : f32 to vector<104x16xf32>
    %23 = arith.maximumf %21, %22 : vector<104x16xf32>
    %24 = vector.extract_strided_slice %23 {offsets = [8, 0], sizes = [96, 16], strides = [1, 1]} : vector<104x16xf32> to vector<96x16xf32>
    %c0_19 = arith.constant 0 : index
    %c0_20 = arith.constant 0 : index
    %c0_21 = arith.constant 0 : index
    %25 = vector.load %arg4[%c0_19, %c0_20, %c0_21] : memref<3x16x16xf32, #tpu.memory_space<vmem>>, vector<1x16x16xf32>
    %26 = vector.shape_cast %25 : vector<1x16x16xf32> to vector<16x16xf32>
    %cst_22 = arith.constant dense<0.000000e+00> : vector<104x16xf32>
    %27 = tpu.matmul %23, %26, %cst_22 {dimension_numbers = #tpu.dot_dimension_numbers<[1], [0], [0], [1], [0, 0, 1, 1], [], []>} : vector<104x16xf32>, vector<16x16xf32>, vector<104x16xf32> -> vector<104x16xf32>
    %c0_23 = arith.constant 0 : index
    %c0_24 = arith.constant 0 : index
    %c0_25 = arith.constant 0 : index
    %28 = vector.load %arg5[%c0_23, %c0_24, %c0_25] : memref<3x1x16xf32, #tpu.memory_space<vmem>>, vector<1x1x16xf32>
    %29 = vector.shape_cast %28 : vector<1x1x16xf32> to vector<1x16xf32>
    %30 = vector.broadcast %29 : vector<1x16xf32> to vector<104x16xf32>
    %31 = arith.addf %27, %30 : vector<104x16xf32>
    %c0_26 = arith.constant 0 : index
    %c0_27 = arith.constant 0 : index
    %c0_28 = arith.constant 0 : index
    %32 = vector.load %arg8[%c0_26, %c0_27, %c0_28] : memref<3x104x16xf32, #tpu.memory_space<vmem>>, vector<1x104x16xf32>
    %33 = vector.shape_cast %32 : vector<1x104x16xf32> to vector<104x16xf32>
    %34 = vector.shape_cast %31 : vector<104x16xf32> to vector<1x104x16xf32>
    tpu.vector_store %arg8[%c0_26, %c0_27, %c0_28], %34 {strides = array<i32>} : memref<3x104x16xf32, #tpu.memory_space<vmem>>, vector<1x104x16xf32>,
    %c0_29 = arith.constant 0 : index
    %c0_30 = arith.constant 0 : index
    %c0_31 = arith.constant 0 : index
    %35 = vector.load %arg6[%c0_29, %c0_30, %c0_31] : memref<3x16x8xf32, #tpu.memory_space<vmem>>, vector<1x16x8xf32>
    %36 = vector.shape_cast %35 : vector<1x16x8xf32> to vector<16x8xf32>
    %cst_32 = arith.constant dense<0.000000e+00> : vector<96x8xf32>
    %37 = tpu.matmul %24, %36, %cst_32 {dimension_numbers = #tpu.dot_dimension_numbers<[1], [0], [0], [1], [0, 0, 1, 1], [], []>} : vector<96x16xf32>, vector<16x8xf32>, vector<96x8xf32> -> vector<96x8xf32>
    %c0_33 = arith.constant 0 : index
    %c0_34 = arith.constant 0 : index
    %c0_35 = arith.constant 0 : index
    %38 = vector.load %arg7[%c0_33, %c0_34, %c0_35] : memref<3x1x8xf32, #tpu.memory_space<vmem>>, vector<1x1x8xf32>
    %39 = vector.shape_cast %38 : vector<1x1x8xf32> to vector<1x8xf32>
    %40 = vector.broadcast %39 : vector<1x8xf32> to vector<96x8xf32>
    %41 = arith.addf %37, %40 : vector<96x8xf32>
    %c0_36 = arith.constant 0 : index
    %c0_37 = arith.constant 0 : index
    %c0_38 = arith.constant 0 : index
    %42 = vector.load %arg9[%c0_36, %c0_37, %c0_38] : memref<3x96x8xf32, #tpu.memory_space<vmem>>, vector<1x96x8xf32>
    %43 = vector.shape_cast %42 : vector<1x96x8xf32> to vector<96x8xf32>
    %44 = vector.shape_cast %41 : vector<96x8xf32> to vector<1x96x8xf32>
    tpu.vector_store %arg9[%c0_36, %c0_37, %c0_38], %44 {strides = array<i32>} : memref<3x96x8xf32, #tpu.memory_space<vmem>>, vector<1x96x8xf32>,
    %c1_39 = arith.constant 1 : index
    %c0_40 = arith.constant 0 : index
    %c0_41 = arith.constant 0 : index
    %45 = vector.load %arg4[%c1_39, %c0_40, %c0_41] : memref<3x16x16xf32, #tpu.memory_space<vmem>>, vector<1x16x16xf32>
    %46 = vector.shape_cast %45 : vector<1x16x16xf32> to vector<16x16xf32>
    %cst_42 = arith.constant dense<0.000000e+00> : vector<104x16xf32>
    %47 = tpu.matmul %23, %46, %cst_42 {dimension_numbers = #tpu.dot_dimension_numbers<[1], [0], [0], [1], [0, 0, 1, 1], [], []>} : vector<104x16xf32>, vector<16x16xf32>, vector<104x16xf32> -> vector<104x16xf32>
    %c1_43 = arith.constant 1 : index
    %c0_44 = arith.constant 0 : index
    %c0_45 = arith.constant 0 : index
    %48 = vector.load %arg5[%c1_43, %c0_44, %c0_45] : memref<3x1x16xf32, #tpu.memory_space<vmem>>, vector<1x1x16xf32>
    %49 = vector.shape_cast %48 : vector<1x1x16xf32> to vector<1x16xf32>
    %50 = vector.broadcast %49 : vector<1x16xf32> to vector<104x16xf32>
    %51 = arith.addf %47, %50 : vector<104x16xf32>
    %c1_46 = arith.constant 1 : index
    %c0_47 = arith.constant 0 : index
    %c0_48 = arith.constant 0 : index
    %52 = vector.load %arg8[%c1_46, %c0_47, %c0_48] : memref<3x104x16xf32, #tpu.memory_space<vmem>>, vector<1x104x16xf32>
    %53 = vector.shape_cast %52 : vector<1x104x16xf32> to vector<104x16xf32>
    %54 = vector.shape_cast %51 : vector<104x16xf32> to vector<1x104x16xf32>
    tpu.vector_store %arg8[%c1_46, %c0_47, %c0_48], %54 {strides = array<i32>} : memref<3x104x16xf32, #tpu.memory_space<vmem>>, vector<1x104x16xf32>,
    %c1_49 = arith.constant 1 : index
    %c0_50 = arith.constant 0 : index
    %c0_51 = arith.constant 0 : index
    %55 = vector.load %arg6[%c1_49, %c0_50, %c0_51] : memref<3x16x8xf32, #tpu.memory_space<vmem>>, vector<1x16x8xf32>
    %56 = vector.shape_cast %55 : vector<1x16x8xf32> to vector<16x8xf32>
    %cst_52 = arith.constant dense<0.000000e+00> : vector<96x8xf32>
    %57 = tpu.matmul %24, %56, %cst_52 {dimension_numbers = #tpu.dot_dimension_numbers<[1], [0], [0], [1], [0, 0, 1, 1], [], []>} : vector<96x16xf32>, vector<16x8xf32>, vector<96x8xf32> -> vector<96x8xf32>
    %c1_53 = arith.constant 1 : index
    %c0_54 = arith.constant 0 : index
    %c0_55 = arith.constant 0 : index
    %58 = vector.load %arg7[%c1_53, %c0_54, %c0_55] : memref<3x1x8xf32, #tpu.memory_space<vmem>>, vector<1x1x8xf32>
    %59 = vector.shape_cast %58 : vector<1x1x8xf32> to vector<1x8xf32>
    %60 = vector.broadcast %59 : vector<1x8xf32> to vector<96x8xf32>
    %61 = arith.addf %57, %60 : vector<96x8xf32>
    %c1_56 = arith.constant 1 : index
    %c0_57 = arith.constant 0 : index
    %c0_58 = arith.constant 0 : index
    %62 = vector.load %arg9[%c1_56, %c0_57, %c0_58] : memref<3x96x8xf32, #tpu.memory_space<vmem>>, vector<1x96x8xf32>
    %63 = vector.shape_cast %62 : vector<1x96x8xf32> to vector<96x8xf32>
    %64 = vector.shape_cast %61 : vector<96x8xf32> to vector<1x96x8xf32>
    tpu.vector_store %arg9[%c1_56, %c0_57, %c0_58], %64 {strides = array<i32>} : memref<3x96x8xf32, #tpu.memory_space<vmem>>, vector<1x96x8xf32>,
    %c2_59 = arith.constant 2 : index
    %c0_60 = arith.constant 0 : index
    %c0_61 = arith.constant 0 : index
    %65 = vector.load %arg4[%c2_59, %c0_60, %c0_61] : memref<3x16x16xf32, #tpu.memory_space<vmem>>, vector<1x16x16xf32>
    %66 = vector.shape_cast %65 : vector<1x16x16xf32> to vector<16x16xf32>
    %cst_62 = arith.constant dense<0.000000e+00> : vector<104x16xf32>
    %67 = tpu.matmul %23, %66, %cst_62 {dimension_numbers = #tpu.dot_dimension_numbers<[1], [0], [0], [1], [0, 0, 1, 1], [], []>} : vector<104x16xf32>, vector<16x16xf32>, vector<104x16xf32> -> vector<104x16xf32>
    %c2_63 = arith.constant 2 : index
    %c0_64 = arith.constant 0 : index
    %c0_65 = arith.constant 0 : index
    %68 = vector.load %arg5[%c2_63, %c0_64, %c0_65] : memref<3x1x16xf32, #tpu.memory_space<vmem>>, vector<1x1x16xf32>
    %69 = vector.shape_cast %68 : vector<1x1x16xf32> to vector<1x16xf32>
    %70 = vector.broadcast %69 : vector<1x16xf32> to vector<104x16xf32>
    %71 = arith.addf %67, %70 : vector<104x16xf32>
    %c2_66 = arith.constant 2 : index
    %c0_67 = arith.constant 0 : index
    %c0_68 = arith.constant 0 : index
    %72 = vector.load %arg8[%c2_66, %c0_67, %c0_68] : memref<3x104x16xf32, #tpu.memory_space<vmem>>, vector<1x104x16xf32>
    %73 = vector.shape_cast %72 : vector<1x104x16xf32> to vector<104x16xf32>
    %74 = vector.shape_cast %71 : vector<104x16xf32> to vector<1x104x16xf32>
    tpu.vector_store %arg8[%c2_66, %c0_67, %c0_68], %74 {strides = array<i32>} : memref<3x104x16xf32, #tpu.memory_space<vmem>>, vector<1x104x16xf32>,
    %c2_69 = arith.constant 2 : index
    %c0_70 = arith.constant 0 : index
    %c0_71 = arith.constant 0 : index
    %75 = vector.load %arg6[%c2_69, %c0_70, %c0_71] : memref<3x16x8xf32, #tpu.memory_space<vmem>>, vector<1x16x8xf32>
    %76 = vector.shape_cast %75 : vector<1x16x8xf32> to vector<16x8xf32>
    %cst_72 = arith.constant dense<0.000000e+00> : vector<96x8xf32>
    %77 = tpu.matmul %24, %76, %cst_72 {dimension_numbers = #tpu.dot_dimension_numbers<[1], [0], [0], [1], [0, 0, 1, 1], [], []>} : vector<96x16xf32>, vector<16x8xf32>, vector<96x8xf32> -> vector<96x8xf32>
    %c2_73 = arith.constant 2 : index
    %c0_74 = arith.constant 0 : index
    %c0_75 = arith.constant 0 : index
    %78 = vector.load %arg7[%c2_73, %c0_74, %c0_75] : memref<3x1x8xf32, #tpu.memory_space<vmem>>, vector<1x1x8xf32>
    %79 = vector.shape_cast %78 : vector<1x1x8xf32> to vector<1x8xf32>
    %80 = vector.broadcast %79 : vector<1x8xf32> to vector<96x8xf32>
    %81 = arith.addf %77, %80 : vector<96x8xf32>
    %c2_76 = arith.constant 2 : index
    %c0_77 = arith.constant 0 : index
    %c0_78 = arith.constant 0 : index
    %82 = vector.load %arg9[%c2_76, %c0_77, %c0_78] : memref<3x96x8xf32, #tpu.memory_space<vmem>>, vector<1x96x8xf32>
    %83 = vector.shape_cast %82 : vector<1x96x8xf32> to vector<96x8xf32>
    %84 = vector.shape_cast %81 : vector<96x8xf32> to vector<1x96x8xf32>
    tpu.vector_store %arg9[%c2_76, %c0_77, %c0_78], %84 {strides = array<i32>} : memref<3x96x8xf32, #tpu.memory_space<vmem>>, vector<1x96x8xf32>,
    return
  }
  func.func @transform_0(%arg0: i32) -> (i32, i32) {
    %c0_i32 = arith.constant 0 : i32
    %c0_i32_0 = arith.constant 0 : i32
    %c0_i32_1 = arith.constant 0 : i32
    return %c0_i32, %c0_i32_0 : i32, i32
  }
  func.func @transform_1(%arg0: i32) -> (i32, i32, i32) {
    %c0_i32 = arith.constant 0 : i32
    %c0_i32_0 = arith.constant 0 : i32
    %c0_i32_1 = arith.constant 0 : i32
    %c0_i32_2 = arith.constant 0 : i32
    return %c0_i32, %c0_i32_0, %c0_i32_1 : i32, i32, i32
  }
  func.func @transform_2(%arg0: i32) -> (i32, i32) {
    %c0_i32 = arith.constant 0 : i32
    %c0_i32_0 = arith.constant 0 : i32
    %c0_i32_1 = arith.constant 0 : i32
    return %c0_i32, %c0_i32_0 : i32, i32
  }
  func.func @transform_3(%arg0: i32) -> (i32, i32, i32) {
    %c0_i32 = arith.constant 0 : i32
    %c0_i32_0 = arith.constant 0 : i32
    %c0_i32_1 = arith.constant 0 : i32
    %c0_i32_2 = arith.constant 0 : i32
    return %c0_i32, %c0_i32_0, %c0_i32_1 : i32, i32, i32
  }
  func.func @transform_4(%arg0: i32) -> (i32, i32, i32) {
    %c0_i32 = arith.constant 0 : i32
    %c0_i32_0 = arith.constant 0 : i32
    %c0_i32_1 = arith.constant 0 : i32
    %c0_i32_2 = arith.constant 0 : i32
    return %c0_i32, %c0_i32_0, %c0_i32_1 : i32, i32, i32
  }
  func.func @transform_5(%arg0: i32) -> (i32, i32, i32) {
    %c0_i32 = arith.constant 0 : i32
    %c0_i32_0 = arith.constant 0 : i32
    %c0_i32_1 = arith.constant 0 : i32
    %c0_i32_2 = arith.constant 0 : i32
    return %c0_i32, %c0_i32_0, %c0_i32_1 : i32, i32, i32
  }
  func.func @transform_6(%arg0: i32) -> (i32, i32, i32) {
    %c0_i32 = arith.constant 0 : i32
    %c0_i32_0 = arith.constant 0 : i32
    %c0_i32_1 = arith.constant 0 : i32
    %c0_i32_2 = arith.constant 0 : i32
    return %c0_i32, %c0_i32_0, %c0_i32_1 : i32, i32, i32
  }
  func.func @transform_7(%arg0: i32) -> (i32, i32, i32) {
    %c0_i32 = arith.constant 0 : i32
    %c0_i32_0 = arith.constant 0 : i32
    %c0_i32_1 = arith.constant 0 : i32
    %c0_i32_2 = arith.constant 0 : i32
    return %c0_i32, %c0_i32_0, %c0_i32_1 : i32, i32, i32
  }
  func.func @transform_8(%arg0: i32) -> (i32, i32, i32) {
    %c0_i32 = arith.constant 0 : i32
    %c0_i32_0 = arith.constant 0 : i32
    %c0_i32_1 = arith.constant 0 : i32
    %c0_i32_2 = arith.constant 0 : i32
    return %c0_i32, %c0_i32_0, %c0_i32_1 : i32, i32, i32
  }
}

module attributes {stable_mosaic.version = 11 : i64} {
  func.func @_gru_kernel(%arg0: i32, %arg1: memref<13x8x16xf32, #tpu.memory_space<vmem>>, %arg2: memref<13x8x16xf32, #tpu.memory_space<vmem>>, %arg3: memref<13x8x16xf32, #tpu.memory_space<vmem>>, %arg4: memref<16x16xf32, #tpu.memory_space<vmem>>, %arg5: memref<16x16xf32, #tpu.memory_space<vmem>>, %arg6: memref<16x16xf32, #tpu.memory_space<vmem>>, %arg7: memref<1x16xf32, #tpu.memory_space<vmem>>, %arg8: memref<8x16xf32, #tpu.memory_space<vmem>>) attributes {dimension_semantics = [#tpu.dimension_semantics<arbitrary>], iteration_bounds = array<i64: 1>, scalar_prefetch = 0 : i64, scratch_operands = 0 : i64, tpu.core_type = #tpu.core_type<tc>, window_params = [{pipeline_mode = #tpu.pipeline_mode<synchronous>, transform_indices = @transform_0, window_bounds = array<i64: 13, 8, 16>}, {pipeline_mode = #tpu.pipeline_mode<synchronous>, transform_indices = @transform_1, window_bounds = array<i64: 13, 8, 16>}, {pipeline_mode = #tpu.pipeline_mode<synchronous>, transform_indices = @transform_2, window_bounds = array<i64: 13, 8, 16>}, {pipeline_mode = #tpu.pipeline_mode<synchronous>, transform_indices = @transform_3, window_bounds = array<i64: 16, 16>}, {pipeline_mode = #tpu.pipeline_mode<synchronous>, transform_indices = @transform_4, window_bounds = array<i64: 16, 16>}, {pipeline_mode = #tpu.pipeline_mode<synchronous>, transform_indices = @transform_5, window_bounds = array<i64: 16, 16>}, {pipeline_mode = #tpu.pipeline_mode<synchronous>, transform_indices = @transform_6, window_bounds = array<i64: 1, 16>}, {pipeline_mode = #tpu.pipeline_mode<synchronous>, transform_indices = @transform_7, window_bounds = array<i64: 8, 16>}]} {
    %c0 = arith.constant 0 : index
    %c0_0 = arith.constant 0 : index
    %0 = vector.load %arg4[%c0, %c0_0] : memref<16x16xf32, #tpu.memory_space<vmem>>, vector<16x16xf32>
    %c0_1 = arith.constant 0 : index
    %c0_2 = arith.constant 0 : index
    %1 = vector.load %arg5[%c0_1, %c0_2] : memref<16x16xf32, #tpu.memory_space<vmem>>, vector<16x16xf32>
    %c0_3 = arith.constant 0 : index
    %c0_4 = arith.constant 0 : index
    %2 = vector.load %arg6[%c0_3, %c0_4] : memref<16x16xf32, #tpu.memory_space<vmem>>, vector<16x16xf32>
    %c0_5 = arith.constant 0 : index
    %c0_6 = arith.constant 0 : index
    %3 = vector.load %arg7[%c0_5, %c0_6] : memref<1x16xf32, #tpu.memory_space<vmem>>, vector<1x16xf32>
    %4 = vector.shape_cast %3 : vector<1x16xf32> to vector<1x16xf32>
    %5 = vector.broadcast %4 : vector<1x16xf32> to vector<8x16xf32>
    %cst = arith.constant 0.000000e+00 : f32
    %6 = vector.broadcast %cst : f32 to vector<8x16xf32>
    %c0_i32 = arith.constant 0 : i32
    %c13_i32 = arith.constant 13 : i32
    %7 = arith.addi %c0_i32, %c13_i32 : i32
    %c1_i32 = arith.constant 1 : i32
    %8 = scf.for %arg9 = %c0_i32 to %7 step %c1_i32 iter_args(%arg10 = %6) -> (vector<8x16xf32>)  : i32 {
      %cst_10 = arith.constant dense<0.000000e+00> : vector<8x16xf32>
      %10 = tpu.matmul %arg10, %0, %cst_10 {dimension_numbers = #tpu.dot_dimension_numbers<[1], [0], [0], [1], [0, 0, 1, 1], [], []>} : vector<8x16xf32>, vector<16x16xf32>, vector<8x16xf32> -> vector<8x16xf32>
      %cst_11 = arith.constant dense<0.000000e+00> : vector<8x16xf32>
      %11 = tpu.matmul %arg10, %1, %cst_11 {dimension_numbers = #tpu.dot_dimension_numbers<[1], [0], [0], [1], [0, 0, 1, 1], [], []>} : vector<8x16xf32>, vector<16x16xf32>, vector<8x16xf32> -> vector<8x16xf32>
      %cst_12 = arith.constant dense<0.000000e+00> : vector<8x16xf32>
      %12 = tpu.matmul %arg10, %2, %cst_12 {dimension_numbers = #tpu.dot_dimension_numbers<[1], [0], [0], [1], [0, 0, 1, 1], [], []>} : vector<8x16xf32>, vector<16x16xf32>, vector<8x16xf32> -> vector<8x16xf32>
      %13 = arith.index_cast %arg9 : i32 to index
      %c0_13 = arith.constant 0 : index
      %c0_14 = arith.constant 0 : index
      %14 = vector.load %arg1[%13, %c0_13, %c0_14] : memref<13x8x16xf32, #tpu.memory_space<vmem>>, vector<1x8x16xf32>
      %15 = vector.shape_cast %14 : vector<1x8x16xf32> to vector<8x16xf32>
      %16 = arith.addf %15, %10 : vector<8x16xf32>
      %17 = arith.negf %16 : vector<8x16xf32>
      %18 = math.exp %17 : vector<8x16xf32>
      %cst_15 = arith.constant 1.000000e+00 : f32
      %19 = vector.broadcast %cst_15 : f32 to vector<8x16xf32>
      %20 = arith.addf %19, %18 : vector<8x16xf32>
      %21 = arith.divf %19, %20 : vector<8x16xf32>
      %22 = arith.index_cast %arg9 : i32 to index
      %c0_16 = arith.constant 0 : index
      %c0_17 = arith.constant 0 : index
      %23 = vector.load %arg2[%22, %c0_16, %c0_17] : memref<13x8x16xf32, #tpu.memory_space<vmem>>, vector<1x8x16xf32>
      %24 = vector.shape_cast %23 : vector<1x8x16xf32> to vector<8x16xf32>
      %25 = arith.addf %24, %11 : vector<8x16xf32>
      %26 = arith.negf %25 : vector<8x16xf32>
      %27 = math.exp %26 : vector<8x16xf32>
      %cst_18 = arith.constant 1.000000e+00 : f32
      %28 = vector.broadcast %cst_18 : f32 to vector<8x16xf32>
      %29 = arith.addf %28, %27 : vector<8x16xf32>
      %30 = arith.divf %28, %29 : vector<8x16xf32>
      %31 = arith.index_cast %arg9 : i32 to index
      %c0_19 = arith.constant 0 : index
      %c0_20 = arith.constant 0 : index
      %32 = vector.load %arg3[%31, %c0_19, %c0_20] : memref<13x8x16xf32, #tpu.memory_space<vmem>>, vector<1x8x16xf32>
      %33 = vector.shape_cast %32 : vector<1x8x16xf32> to vector<8x16xf32>
      %34 = arith.addf %12, %5 : vector<8x16xf32>
      %35 = arith.mulf %21, %34 : vector<8x16xf32>
      %36 = arith.addf %33, %35 : vector<8x16xf32>
      %37 = math.tanh %36 : vector<8x16xf32>
      %cst_21 = arith.constant 1.000000e+00 : f32
      %38 = vector.broadcast %cst_21 : f32 to vector<8x16xf32>
      %39 = arith.subf %38, %30 : vector<8x16xf32>
      %40 = arith.mulf %39, %37 : vector<8x16xf32>
      %41 = arith.mulf %30, %arg10 : vector<8x16xf32>
      %42 = arith.addf %40, %41 : vector<8x16xf32>
      scf.yield %42 : vector<8x16xf32>
    }
    %c13_i32_7 = arith.constant 13 : i32
    %c0_8 = arith.constant 0 : index
    %c0_9 = arith.constant 0 : index
    %9 = vector.load %arg8[%c0_8, %c0_9] : memref<8x16xf32, #tpu.memory_space<vmem>>, vector<8x16xf32>
    tpu.vector_store %arg8[%c0_8, %c0_9], %8 {strides = array<i32>} : memref<8x16xf32, #tpu.memory_space<vmem>>, vector<8x16xf32>,
    return
  }
  func.func @transform_0(%arg0: i32) -> (i32, i32, i32) {
    %c0_i32 = arith.constant 0 : i32
    %c0_i32_0 = arith.constant 0 : i32
    %c0_i32_1 = arith.constant 0 : i32
    %c0_i32_2 = arith.constant 0 : i32
    return %c0_i32, %c0_i32_0, %c0_i32_1 : i32, i32, i32
  }
  func.func @transform_1(%arg0: i32) -> (i32, i32, i32) {
    %c0_i32 = arith.constant 0 : i32
    %c0_i32_0 = arith.constant 0 : i32
    %c0_i32_1 = arith.constant 0 : i32
    %c0_i32_2 = arith.constant 0 : i32
    return %c0_i32, %c0_i32_0, %c0_i32_1 : i32, i32, i32
  }
  func.func @transform_2(%arg0: i32) -> (i32, i32, i32) {
    %c0_i32 = arith.constant 0 : i32
    %c0_i32_0 = arith.constant 0 : i32
    %c0_i32_1 = arith.constant 0 : i32
    %c0_i32_2 = arith.constant 0 : i32
    return %c0_i32, %c0_i32_0, %c0_i32_1 : i32, i32, i32
  }
  func.func @transform_3(%arg0: i32) -> (i32, i32) {
    %c0_i32 = arith.constant 0 : i32
    %c0_i32_0 = arith.constant 0 : i32
    %c0_i32_1 = arith.constant 0 : i32
    return %c0_i32, %c0_i32_0 : i32, i32
  }
  func.func @transform_4(%arg0: i32) -> (i32, i32) {
    %c0_i32 = arith.constant 0 : i32
    %c0_i32_0 = arith.constant 0 : i32
    %c0_i32_1 = arith.constant 0 : i32
    return %c0_i32, %c0_i32_0 : i32, i32
  }
  func.func @transform_5(%arg0: i32) -> (i32, i32) {
    %c0_i32 = arith.constant 0 : i32
    %c0_i32_0 = arith.constant 0 : i32
    %c0_i32_1 = arith.constant 0 : i32
    return %c0_i32, %c0_i32_0 : i32, i32
  }
  func.func @transform_6(%arg0: i32) -> (i32, i32) {
    %c0_i32 = arith.constant 0 : i32
    %c0_i32_0 = arith.constant 0 : i32
    %c0_i32_1 = arith.constant 0 : i32
    return %c0_i32, %c0_i32_0 : i32, i32
  }
  func.func @transform_7(%arg0: i32) -> (i32, i32) {
    %c0_i32 = arith.constant 0 : i32
    %c0_i32_0 = arith.constant 0 : i32
    %c0_i32_1 = arith.constant 0 : i32
    return %c0_i32, %c0_i32_0 : i32, i32
  }
}

module attributes {stable_mosaic.version = 11 : i64} {
  func.func @_gru_kernel(%arg0: i32, %arg1: memref<3x32x8xf32, #tpu.memory_space<vmem>>, %arg2: memref<3x32x8xf32, #tpu.memory_space<vmem>>, %arg3: memref<3x32x8xf32, #tpu.memory_space<vmem>>, %arg4: memref<8x8xf32, #tpu.memory_space<vmem>>, %arg5: memref<8x8xf32, #tpu.memory_space<vmem>>, %arg6: memref<8x8xf32, #tpu.memory_space<vmem>>, %arg7: memref<1x8xf32, #tpu.memory_space<vmem>>, %arg8: memref<32x8xf32, #tpu.memory_space<vmem>>) attributes {dimension_semantics = [#tpu.dimension_semantics<arbitrary>], iteration_bounds = array<i64: 1>, scalar_prefetch = 0 : i64, scratch_operands = 0 : i64, tpu.core_type = #tpu.core_type<tc>, window_params = [{pipeline_mode = #tpu.pipeline_mode<synchronous>, transform_indices = @transform_0, window_bounds = array<i64: 3, 32, 8>}, {pipeline_mode = #tpu.pipeline_mode<synchronous>, transform_indices = @transform_1, window_bounds = array<i64: 3, 32, 8>}, {pipeline_mode = #tpu.pipeline_mode<synchronous>, transform_indices = @transform_2, window_bounds = array<i64: 3, 32, 8>}, {pipeline_mode = #tpu.pipeline_mode<synchronous>, transform_indices = @transform_3, window_bounds = array<i64: 8, 8>}, {pipeline_mode = #tpu.pipeline_mode<synchronous>, transform_indices = @transform_4, window_bounds = array<i64: 8, 8>}, {pipeline_mode = #tpu.pipeline_mode<synchronous>, transform_indices = @transform_5, window_bounds = array<i64: 8, 8>}, {pipeline_mode = #tpu.pipeline_mode<synchronous>, transform_indices = @transform_6, window_bounds = array<i64: 1, 8>}, {pipeline_mode = #tpu.pipeline_mode<synchronous>, transform_indices = @transform_7, window_bounds = array<i64: 32, 8>}]} {
    %c0 = arith.constant 0 : index
    %c0_0 = arith.constant 0 : index
    %0 = vector.load %arg4[%c0, %c0_0] : memref<8x8xf32, #tpu.memory_space<vmem>>, vector<8x8xf32>
    %c0_1 = arith.constant 0 : index
    %c0_2 = arith.constant 0 : index
    %1 = vector.load %arg5[%c0_1, %c0_2] : memref<8x8xf32, #tpu.memory_space<vmem>>, vector<8x8xf32>
    %c0_3 = arith.constant 0 : index
    %c0_4 = arith.constant 0 : index
    %2 = vector.load %arg6[%c0_3, %c0_4] : memref<8x8xf32, #tpu.memory_space<vmem>>, vector<8x8xf32>
    %c0_5 = arith.constant 0 : index
    %c0_6 = arith.constant 0 : index
    %3 = vector.load %arg7[%c0_5, %c0_6] : memref<1x8xf32, #tpu.memory_space<vmem>>, vector<1x8xf32>
    %4 = vector.shape_cast %3 : vector<1x8xf32> to vector<1x8xf32>
    %5 = vector.broadcast %4 : vector<1x8xf32> to vector<32x8xf32>
    %cst = arith.constant 0.000000e+00 : f32
    %6 = vector.broadcast %cst : f32 to vector<32x8xf32>
    %c0_i32 = arith.constant 0 : i32
    %c3_i32 = arith.constant 3 : i32
    %7 = arith.addi %c0_i32, %c3_i32 : i32
    %c1_i32 = arith.constant 1 : i32
    %8 = scf.for %arg9 = %c0_i32 to %7 step %c1_i32 iter_args(%arg10 = %6) -> (vector<32x8xf32>)  : i32 {
      %cst_10 = arith.constant dense<0.000000e+00> : vector<32x8xf32>
      %10 = tpu.matmul %arg10, %0, %cst_10 {dimension_numbers = #tpu.dot_dimension_numbers<[1], [0], [0], [1], [0, 0, 1, 1], [], []>} : vector<32x8xf32>, vector<8x8xf32>, vector<32x8xf32> -> vector<32x8xf32>
      %cst_11 = arith.constant dense<0.000000e+00> : vector<32x8xf32>
      %11 = tpu.matmul %arg10, %1, %cst_11 {dimension_numbers = #tpu.dot_dimension_numbers<[1], [0], [0], [1], [0, 0, 1, 1], [], []>} : vector<32x8xf32>, vector<8x8xf32>, vector<32x8xf32> -> vector<32x8xf32>
      %cst_12 = arith.constant dense<0.000000e+00> : vector<32x8xf32>
      %12 = tpu.matmul %arg10, %2, %cst_12 {dimension_numbers = #tpu.dot_dimension_numbers<[1], [0], [0], [1], [0, 0, 1, 1], [], []>} : vector<32x8xf32>, vector<8x8xf32>, vector<32x8xf32> -> vector<32x8xf32>
      %13 = arith.index_cast %arg9 : i32 to index
      %c0_13 = arith.constant 0 : index
      %c0_14 = arith.constant 0 : index
      %14 = vector.load %arg1[%13, %c0_13, %c0_14] : memref<3x32x8xf32, #tpu.memory_space<vmem>>, vector<1x32x8xf32>
      %15 = vector.shape_cast %14 : vector<1x32x8xf32> to vector<32x8xf32>
      %16 = arith.addf %15, %10 : vector<32x8xf32>
      %17 = arith.negf %16 : vector<32x8xf32>
      %18 = math.exp %17 : vector<32x8xf32>
      %cst_15 = arith.constant 1.000000e+00 : f32
      %19 = vector.broadcast %cst_15 : f32 to vector<32x8xf32>
      %20 = arith.addf %19, %18 : vector<32x8xf32>
      %21 = arith.divf %19, %20 : vector<32x8xf32>
      %22 = arith.index_cast %arg9 : i32 to index
      %c0_16 = arith.constant 0 : index
      %c0_17 = arith.constant 0 : index
      %23 = vector.load %arg2[%22, %c0_16, %c0_17] : memref<3x32x8xf32, #tpu.memory_space<vmem>>, vector<1x32x8xf32>
      %24 = vector.shape_cast %23 : vector<1x32x8xf32> to vector<32x8xf32>
      %25 = arith.addf %24, %11 : vector<32x8xf32>
      %26 = arith.negf %25 : vector<32x8xf32>
      %27 = math.exp %26 : vector<32x8xf32>
      %cst_18 = arith.constant 1.000000e+00 : f32
      %28 = vector.broadcast %cst_18 : f32 to vector<32x8xf32>
      %29 = arith.addf %28, %27 : vector<32x8xf32>
      %30 = arith.divf %28, %29 : vector<32x8xf32>
      %31 = arith.index_cast %arg9 : i32 to index
      %c0_19 = arith.constant 0 : index
      %c0_20 = arith.constant 0 : index
      %32 = vector.load %arg3[%31, %c0_19, %c0_20] : memref<3x32x8xf32, #tpu.memory_space<vmem>>, vector<1x32x8xf32>
      %33 = vector.shape_cast %32 : vector<1x32x8xf32> to vector<32x8xf32>
      %34 = arith.addf %12, %5 : vector<32x8xf32>
      %35 = arith.mulf %21, %34 : vector<32x8xf32>
      %36 = arith.addf %33, %35 : vector<32x8xf32>
      %37 = math.tanh %36 : vector<32x8xf32>
      %cst_21 = arith.constant 1.000000e+00 : f32
      %38 = vector.broadcast %cst_21 : f32 to vector<32x8xf32>
      %39 = arith.subf %38, %30 : vector<32x8xf32>
      %40 = arith.mulf %39, %37 : vector<32x8xf32>
      %41 = arith.mulf %30, %arg10 : vector<32x8xf32>
      %42 = arith.addf %40, %41 : vector<32x8xf32>
      scf.yield %42 : vector<32x8xf32>
    }
    %c3_i32_7 = arith.constant 3 : i32
    %c0_8 = arith.constant 0 : index
    %c0_9 = arith.constant 0 : index
    %9 = vector.load %arg8[%c0_8, %c0_9] : memref<32x8xf32, #tpu.memory_space<vmem>>, vector<32x8xf32>
    tpu.vector_store %arg8[%c0_8, %c0_9], %8 {strides = array<i32>} : memref<32x8xf32, #tpu.memory_space<vmem>>, vector<32x8xf32>,
    return
  }
  func.func @transform_0(%arg0: i32) -> (i32, i32, i32) {
    %c0_i32 = arith.constant 0 : i32
    %c0_i32_0 = arith.constant 0 : i32
    %c0_i32_1 = arith.constant 0 : i32
    %c0_i32_2 = arith.constant 0 : i32
    return %c0_i32, %c0_i32_0, %c0_i32_1 : i32, i32, i32
  }
  func.func @transform_1(%arg0: i32) -> (i32, i32, i32) {
    %c0_i32 = arith.constant 0 : i32
    %c0_i32_0 = arith.constant 0 : i32
    %c0_i32_1 = arith.constant 0 : i32
    %c0_i32_2 = arith.constant 0 : i32
    return %c0_i32, %c0_i32_0, %c0_i32_1 : i32, i32, i32
  }
  func.func @transform_2(%arg0: i32) -> (i32, i32, i32) {
    %c0_i32 = arith.constant 0 : i32
    %c0_i32_0 = arith.constant 0 : i32
    %c0_i32_1 = arith.constant 0 : i32
    %c0_i32_2 = arith.constant 0 : i32
    return %c0_i32, %c0_i32_0, %c0_i32_1 : i32, i32, i32
  }
  func.func @transform_3(%arg0: i32) -> (i32, i32) {
    %c0_i32 = arith.constant 0 : i32
    %c0_i32_0 = arith.constant 0 : i32
    %c0_i32_1 = arith.constant 0 : i32
    return %c0_i32, %c0_i32_0 : i32, i32
  }
  func.func @transform_4(%arg0: i32) -> (i32, i32) {
    %c0_i32 = arith.constant 0 : i32
    %c0_i32_0 = arith.constant 0 : i32
    %c0_i32_1 = arith.constant 0 : i32
    return %c0_i32, %c0_i32_0 : i32, i32
  }
  func.func @transform_5(%arg0: i32) -> (i32, i32) {
    %c0_i32 = arith.constant 0 : i32
    %c0_i32_0 = arith.constant 0 : i32
    %c0_i32_1 = arith.constant 0 : i32
    return %c0_i32, %c0_i32_0 : i32, i32
  }
  func.func @transform_6(%arg0: i32) -> (i32, i32) {
    %c0_i32 = arith.constant 0 : i32
    %c0_i32_0 = arith.constant 0 : i32
    %c0_i32_1 = arith.constant 0 : i32
    return %c0_i32, %c0_i32_0 : i32, i32
  }
  func.func @transform_7(%arg0: i32) -> (i32, i32) {
    %c0_i32 = arith.constant 0 : i32
    %c0_i32_0 = arith.constant 0 : i32
    %c0_i32_1 = arith.constant 0 : i32
    return %c0_i32, %c0_i32_0 : i32, i32
  }
}

module attributes {stable_mosaic.version = 11 : i64} {
  func.func @_tail_kernel(%arg0: i32, %arg1: memref<2x16xf32, #tpu.memory_space<vmem>>, %arg2: memref<2x32xf32, #tpu.memory_space<vmem>>, %arg3: memref<16x8xf32, #tpu.memory_space<vmem>>, %arg4: memref<32x8xf32, #tpu.memory_space<vmem>>, %arg5: memref<1x8xf32, #tpu.memory_space<vmem>>, %arg6: memref<4x2x8xf32, #tpu.memory_space<vmem>>, %arg7: memref<4xf32, #tpu.memory_space<smem>>, %arg8: memref<2x8xf32, #tpu.memory_space<vmem>>) attributes {dimension_semantics = [#tpu.dimension_semantics<arbitrary>], iteration_bounds = array<i64: 1>, scalar_prefetch = 0 : i64, scratch_operands = 0 : i64, tpu.core_type = #tpu.core_type<tc>, window_params = [{pipeline_mode = #tpu.pipeline_mode<synchronous>, transform_indices = @transform_0, window_bounds = array<i64: 2, 16>}, {pipeline_mode = #tpu.pipeline_mode<synchronous>, transform_indices = @transform_1, window_bounds = array<i64: 2, 32>}, {pipeline_mode = #tpu.pipeline_mode<synchronous>, transform_indices = @transform_2, window_bounds = array<i64: 16, 8>}, {pipeline_mode = #tpu.pipeline_mode<synchronous>, transform_indices = @transform_3, window_bounds = array<i64: 32, 8>}, {pipeline_mode = #tpu.pipeline_mode<synchronous>, transform_indices = @transform_4, window_bounds = array<i64: 1, 8>}, {pipeline_mode = #tpu.pipeline_mode<synchronous>, transform_indices = @transform_5, window_bounds = array<i64: 4, 2, 8>}, {transform_indices = @transform_6, window_bounds = array<i64: 4>}, {pipeline_mode = #tpu.pipeline_mode<synchronous>, transform_indices = @transform_7, window_bounds = array<i64: 2, 8>}]} {
    %c0 = arith.constant 0 : index
    %c0_0 = arith.constant 0 : index
    %0 = vector.load %arg1[%c0, %c0_0] : memref<2x16xf32, #tpu.memory_space<vmem>>, vector<2x16xf32>
    %c0_1 = arith.constant 0 : index
    %c0_2 = arith.constant 0 : index
    %1 = vector.load %arg3[%c0_1, %c0_2] : memref<16x8xf32, #tpu.memory_space<vmem>>, vector<16x8xf32>
    %cst = arith.constant dense<0.000000e+00> : vector<2x8xf32>
    %2 = tpu.matmul %0, %1, %cst {dimension_numbers = #tpu.dot_dimension_numbers<[1], [0], [0], [1], [0, 0, 1, 1], [], []>} : vector<2x16xf32>, vector<16x8xf32>, vector<2x8xf32> -> vector<2x8xf32>
    %c0_3 = arith.constant 0 : index
    %c0_4 = arith.constant 0 : index
    %3 = vector.load %arg2[%c0_3, %c0_4] : memref<2x32xf32, #tpu.memory_space<vmem>>, vector<2x32xf32>
    %c0_5 = arith.constant 0 : index
    %c0_6 = arith.constant 0 : index
    %4 = vector.load %arg4[%c0_5, %c0_6] : memref<32x8xf32, #tpu.memory_space<vmem>>, vector<32x8xf32>
    %cst_7 = arith.constant dense<0.000000e+00> : vector<2x8xf32>
    %5 = tpu.matmul %3, %4, %cst_7 {dimension_numbers = #tpu.dot_dimension_numbers<[1], [0], [0], [1], [0, 0, 1, 1], [], []>} : vector<2x32xf32>, vector<32x8xf32>, vector<2x8xf32> -> vector<2x8xf32>
    %6 = arith.addf %2, %5 : vector<2x8xf32>
    %c0_8 = arith.constant 0 : index
    %7 = memref.load %arg7[%c0_8] : memref<4xf32, #tpu.memory_space<smem>>
    %c0_9 = arith.constant 0 : index
    %c0_10 = arith.constant 0 : index
    %c0_11 = arith.constant 0 : index
    %8 = vector.load %arg6[%c0_9, %c0_10, %c0_11] : memref<4x2x8xf32, #tpu.memory_space<vmem>>, vector<1x2x8xf32>
    %9 = vector.shape_cast %8 : vector<1x2x8xf32> to vector<2x8xf32>
    %10 = vector.broadcast %7 : f32 to vector<2x8xf32>
    %11 = arith.mulf %10, %9 : vector<2x8xf32>
    %c1 = arith.constant 1 : index
    %12 = memref.load %arg7[%c1] : memref<4xf32, #tpu.memory_space<smem>>
    %c1_12 = arith.constant 1 : index
    %c0_13 = arith.constant 0 : index
    %c0_14 = arith.constant 0 : index
    %13 = vector.load %arg6[%c1_12, %c0_13, %c0_14] : memref<4x2x8xf32, #tpu.memory_space<vmem>>, vector<1x2x8xf32>
    %14 = vector.shape_cast %13 : vector<1x2x8xf32> to vector<2x8xf32>
    %15 = vector.broadcast %12 : f32 to vector<2x8xf32>
    %16 = arith.mulf %15, %14 : vector<2x8xf32>
    %17 = arith.addf %11, %16 : vector<2x8xf32>
    %c2 = arith.constant 2 : index
    %18 = memref.load %arg7[%c2] : memref<4xf32, #tpu.memory_space<smem>>
    %c2_15 = arith.constant 2 : index
    %c0_16 = arith.constant 0 : index
    %c0_17 = arith.constant 0 : index
    %19 = vector.load %arg6[%c2_15, %c0_16, %c0_17] : memref<4x2x8xf32, #tpu.memory_space<vmem>>, vector<1x2x8xf32>
    %20 = vector.shape_cast %19 : vector<1x2x8xf32> to vector<2x8xf32>
    %21 = vector.broadcast %18 : f32 to vector<2x8xf32>
    %22 = arith.mulf %21, %20 : vector<2x8xf32>
    %23 = arith.addf %17, %22 : vector<2x8xf32>
    %c3 = arith.constant 3 : index
    %24 = memref.load %arg7[%c3] : memref<4xf32, #tpu.memory_space<smem>>
    %c3_18 = arith.constant 3 : index
    %c0_19 = arith.constant 0 : index
    %c0_20 = arith.constant 0 : index
    %25 = vector.load %arg6[%c3_18, %c0_19, %c0_20] : memref<4x2x8xf32, #tpu.memory_space<vmem>>, vector<1x2x8xf32>
    %26 = vector.shape_cast %25 : vector<1x2x8xf32> to vector<2x8xf32>
    %27 = vector.broadcast %24 : f32 to vector<2x8xf32>
    %28 = arith.mulf %27, %26 : vector<2x8xf32>
    %29 = arith.addf %23, %28 : vector<2x8xf32>
    %c0_21 = arith.constant 0 : index
    %c0_22 = arith.constant 0 : index
    %30 = vector.load %arg5[%c0_21, %c0_22] : memref<1x8xf32, #tpu.memory_space<vmem>>, vector<1x8xf32>
    %31 = vector.broadcast %30 : vector<1x8xf32> to vector<2x8xf32>
    %32 = arith.addf %6, %31 : vector<2x8xf32>
    %33 = arith.addf %32, %29 : vector<2x8xf32>
    %34 = arith.negf %33 : vector<2x8xf32>
    %35 = math.exp %34 : vector<2x8xf32>
    %cst_23 = arith.constant 1.000000e+00 : f32
    %36 = vector.broadcast %cst_23 : f32 to vector<2x8xf32>
    %37 = arith.addf %36, %35 : vector<2x8xf32>
    %38 = arith.divf %36, %37 : vector<2x8xf32>
    %c0_24 = arith.constant 0 : index
    %c0_25 = arith.constant 0 : index
    %39 = vector.load %arg8[%c0_24, %c0_25] : memref<2x8xf32, #tpu.memory_space<vmem>>, vector<2x8xf32>
    tpu.vector_store %arg8[%c0_24, %c0_25], %38 {strides = array<i32>} : memref<2x8xf32, #tpu.memory_space<vmem>>, vector<2x8xf32>,
    return
  }
  func.func @transform_0(%arg0: i32) -> (i32, i32) {
    %c0_i32 = arith.constant 0 : i32
    %c0_i32_0 = arith.constant 0 : i32
    %c0_i32_1 = arith.constant 0 : i32
    return %c0_i32, %c0_i32_0 : i32, i32
  }
  func.func @transform_1(%arg0: i32) -> (i32, i32) {
    %c0_i32 = arith.constant 0 : i32
    %c0_i32_0 = arith.constant 0 : i32
    %c0_i32_1 = arith.constant 0 : i32
    return %c0_i32, %c0_i32_0 : i32, i32
  }
  func.func @transform_2(%arg0: i32) -> (i32, i32) {
    %c0_i32 = arith.constant 0 : i32
    %c0_i32_0 = arith.constant 0 : i32
    %c0_i32_1 = arith.constant 0 : i32
    return %c0_i32, %c0_i32_0 : i32, i32
  }
  func.func @transform_3(%arg0: i32) -> (i32, i32) {
    %c0_i32 = arith.constant 0 : i32
    %c0_i32_0 = arith.constant 0 : i32
    %c0_i32_1 = arith.constant 0 : i32
    return %c0_i32, %c0_i32_0 : i32, i32
  }
  func.func @transform_4(%arg0: i32) -> (i32, i32) {
    %c0_i32 = arith.constant 0 : i32
    %c0_i32_0 = arith.constant 0 : i32
    %c0_i32_1 = arith.constant 0 : i32
    return %c0_i32, %c0_i32_0 : i32, i32
  }
  func.func @transform_5(%arg0: i32) -> (i32, i32, i32) {
    %c0_i32 = arith.constant 0 : i32
    %c0_i32_0 = arith.constant 0 : i32
    %c0_i32_1 = arith.constant 0 : i32
    %c0_i32_2 = arith.constant 0 : i32
    return %c0_i32, %c0_i32_0, %c0_i32_1 : i32, i32, i32
  }
  func.func @transform_6(%arg0: i32) -> i32 {
    %c0_i32 = arith.constant 0 : i32
    %c0_i32_0 = arith.constant 0 : i32
    return %c0_i32 : i32
  }
  func.func @transform_7(%arg0: i32) -> (i32, i32) {
    %c0_i32 = arith.constant 0 : i32
    %c0_i32_0 = arith.constant 0 : i32
    %c0_i32_1 = arith.constant 0 : i32
    return %c0_i32, %c0_i32_0 : i32, i32
  }
}

</mosaic_0001>

<bundles_post_ra>
// kernel: _lambda_.5
= control target key start
LH: loop header
LB: loop body
LE: loop exit
PB: predicated region body
PF: predicated region fallthrough
CT: control target
= control target key end

     0   :  { %v466_v7 = vmov 0.0   ;;  %s468_s14 = smov 0   ;;  %s506_s0 = inlined_call_operand.vmem [shape: f32[13,8,16], index: 0, kind: input, shape index: {}]   ;;  %s507_s1 = inlined_call_operand.vmem [shape: f32[13,8,16], index: 1, kind: input, shape index: {}]   ;;  %s508_s2 = inlined_call_operand.vmem [shape: f32[13,8,16], index: 2, kind: input, shape index: {}]   ;;  %s509_s3 = inlined_call_operand.vmem [shape: f32[16,16], index: 3, kind: input, shape index: {}]   ;;  %s510_s4 = inlined_call_operand.vmem [shape: f32[16,16], index: 4, kind: input, shape index: {}]   ;;  %s511_s5 = inlined_call_operand.vmem [shape: f32[16,16], index: 5, kind: input, shape index: {}]   ;;  %s512_s6 = inlined_call_operand.vmem [shape: f32[1,16], index: 6, kind: input, shape index: {}]   ;;  %s513_s7 = inlined_call_operand.vmem [shape: f32[8,16], index: 7, kind: output, shape index: {}]  }
   0x1   :  { %v434_v0 = vld [vmem:[%s509_s3] sm:$0xff]  ;;  %v439_v1 = vld [vmem:[%s509_s3 + $0x8] sm:$0xff] }
   0x2   :  { %v444_v2 = vld [vmem:[%s510_s4] sm:$0xff]  ;;  %v449_v3 = vld [vmem:[%s510_s4 + $0x8] sm:$0xff] }
   0x3   :  { %v454_v4 = vld [vmem:[%s511_s5] sm:$0xff]  ;;  %v459_v5 = vld [vmem:[%s511_s5 + $0x8] sm:$0xff] }
   0x4   :  { %v464_v6 = vld [vmem:[%s512_s6] ss:$0 sm:$0xff] }
   0x5 LB: > { %v389_v8 = vmov 0.0   ;;  %vm390_vm0 = vmmov 0   ;;  %vm46_vm1 = vcmask 130048   ;;  %s311_s4 = sshll.u32 %s387_s14, 3  ;;  %s44_s14 = sadd.s32 1, %s387_s14   ;;  %s387_s14 = sphi %s468_s14, %s44_s14   ;;  %v383_v7 = vphi %v466_v7, %v514_v7  }
   0x6   : > { %324 = vmatprep.subr.mxu0 %v389_v8  ;;  %328 = vmatprep.mubr.msk.f32.mxu0 %vm390_vm0, %v389_v8  ;;  %s191_s15 = scalar_lea.vmem %s506_s0, %s311_s4  ;;  %s200_s18 = scalar_lea.vmem %s507_s1, %s311_s4 }
   0x7   : > { %325 = vmatpush3.msra.mxu0 %v439_v1  ;;  %331 = vmatprep.subr.mxu1 %v389_v8  ;;  %v192_v9 = vld [vmem:[%s191_s15] sm:$0xff]  ;;  %s209_s21 = scalar_lea.vmem %s508_s2, %s311_s4  ;;  %p41_p0 = scmp.ge.s32.totalorder %s44_s14, 13  }
   0x8   : > { %326 = vmatprep.subr.mxu0 %v389_v8  ;;  %332 = vmatpush3.msra.mxu1 %v449_v3  ;;  %v201_v14 = vld [vmem:[%s200_s18] sm:$0xff] }
   0x9   : > { %327 = vmatpush3.msra.mxu0 %v434_v0  ;;  %333 = vmatprep.subr.mxu1 %v389_v8  ;;  %v210_v27 = vld [vmem:[%s209_s21] sm:$0xff] }
   0xa   : > { %329 = vmatmul.mubr.msk.f32.vlgmr.msra.gmra.mxu0 %vm46_vm1, %v383_v7  ;;  %334 = vmatpush3.msra.mxu1 %v444_v2 }
   0xb   : > { %335 = vmatprep.mubr.msk.f32.mxu1 %vm390_vm0, %v389_v8  ;;  %338 = vmatprep.subr.mxu0 %v389_v8 }
   0xc   : > { %336 = vmatmul.mubr.msk.f32.vlgmr.msra.gmra.mxu1 %vm46_vm1, %v383_v7  ;;  %339 = vmatpush3.msra.mxu0 %v459_v5 }
   0xd   : > { %340 = vmatprep.subr.mxu0 %v389_v8  ;;  %342 = vmatprep.mubr.msk.f32.mxu0 %vm390_vm0, %v389_v8 }
   0xe   : > { %341 = vmatpush3.msra.mxu0 %v454_v4 }
   0xf   : > { %343 = vmatmul.mubr.msk.f32.vlgmr.msra.gmra.mxu0 %vm46_vm1, %v383_v7 }
  0xca   : > { %v116_v10 = vpop.f32.mrf.mxu0 }
  0xcb   : > { %v193_v11 = vadd.f32 %v192_v9, %v116_v10 }
  0xcc   : > { %v330_v12 = vpop.f32.mrf.mxu0  ;;  %v186_v13 = vpop.f32.mrf.mxu1 }
  0xcd   : > { %v312_v15 = vmul.f32 -1.442695, %v193_v11  ;;  %v202_v17 = vadd.f32 %v201_v14, %v186_v13 }
  0xce   : > { %v337_v16 = vpop.f32.mrf.mxu1 }
  0xcf   : > { %363 = vpow2.f32 %v312_v15  ;;  %v277_v18 = vpop.f32.mrf.mxu0  ;;  %v313_v20 = vmul.f32 -1.442695, %v202_v17 }
  0xd0   : > { %v278_v25 = vadd.f32 %v464_v6, %v277_v18 }
  0xd1   : > { %v344_v19 = vpop.f32.mrf.mxu0  ;;  %365 = vpow2.f32 %v313_v20 }
  0xdc   : > { %v364_v21 = vpop.eup %363 }
  0xdd   : > { %v197_v22 = vadd.f32 1.0, %v364_v21 }
  0xde   : > { %v366_v23 = vpop.eup %365 }
  0xdf   : > { %367 = vrcp.f32 %v197_v22  ;;  %v206_v24 = vadd.f32 1.0, %v366_v23 }
  0xe1   : > { %369 = vrcp.f32 %v206_v24 }
  0xec   : > { %v368_v26 = vpop.eup %367 }
  0xed   : > { %v281_v28 = vmul.f32 %v368_v26, %v278_v25 }
  0xee   : > { %v370_v30 = vpop.eup %369 }
  0xef   : > { %v282_v29 = vadd.f32 %v281_v28, %v210_v27  ;;  %v284_v31 = vsub.f32 1.0, %v370_v30  ;;  %v286_v33 = vmul.f32 %v383_v7, %v370_v30 }
  0xf1   : > { %371 = vtanh.f32 %v282_v29 }
  0xfe   : > { %v372_v32 = vpop.eup %371 }
  0xff   : > { %v285_v34 = vmul.f32 %v372_v32, %v284_v31  ;;  %43 = sbr.rel (!%p41_p0) target bundleno = 5 (0x5), region = 58 }
 0x101   : > { %v287_v35 = vadd.f32 %v286_v33, %v285_v34  }
 0x103   : > { %v514_v7 = vmov %v287_v35  ;;  %289 = vst.msk [vmem:[%s513_s7] sm:$0xff] (%p41_p0), %vm46_vm1, %v287_v35 }

// kernel: _lambda_.6
= control target key start
LH: loop header
LB: loop body
LE: loop exit
PB: predicated region body
PF: predicated region fallthrough
CT: control target
= control target key end

     0   :  { %v689_v4 = vmov 0.0   ;;  %v691_v5 = vmov 0.0   ;;  %v693_v6 = vmov 0.0   ;;  %v695_v7 = vmov 0.0   ;;  %s796_s0 = inlined_call_operand.vmem [shape: f32[3,32,8], index: 0, kind: input, shape index: {}]   ;;  %s797_s1 = inlined_call_operand.vmem [shape: f32[3,32,8], index: 1, kind: input, shape index: {}]   ;;  %s798_s2 = inlined_call_operand.vmem [shape: f32[3,32,8], index: 2, kind: input, shape index: {}]   ;;  %s799_s3 = inlined_call_operand.vmem [shape: f32[8,8], index: 3, kind: input, shape index: {}]   ;;  %s800_s4 = inlined_call_operand.vmem [shape: f32[8,8], index: 4, kind: input, shape index: {}]   ;;  %s801_s5 = inlined_call_operand.vmem [shape: f32[8,8], index: 5, kind: input, shape index: {}]   ;;  %s802_s6 = inlined_call_operand.vmem [shape: f32[1,8], index: 6, kind: input, shape index: {}]   ;;  %s803_s7 = inlined_call_operand.vmem [shape: f32[32,8], index: 7, kind: output, shape index: {}]  }
   0x1   :  { %v672_v0 = vld [vmem:[%s799_s3] sm:$0xff]  ;;  %s697_s3 = smov 0  }
   0x2   :  { %v677_v1 = vld [vmem:[%s800_s4] sm:$0xff] }
   0x3   :  { %v682_v2 = vld [vmem:[%s801_s5] sm:$0xff] }
   0x4   :  { %v687_v3 = vld [vmem:[%s802_s6] ss:$0 sm:$0xff] }
   0x5 LB: > { %483 = vmatprep.subr.mxu0 %v672_v0  ;;  %507 = vmatprep.subr.mxu1 %v672_v0  ;;  %vm46_vm0 = vcmask 64512   ;;  %s747_s4 = sshll.u32 %s627_s3, 5  ;;  %s41_s3 = sadd.s32 1, %s627_s3   ;;  %s627_s3 = sphi %s697_s3, %s41_s3   ;;  %v623_v7 = vphi %v695_v7, %v807_v7   ;;  %v619_v6 = vphi %v693_v6, %v806_v6   ;;  %v615_v5 = vphi %v691_v5, %v805_v5   ;;  %v611_v4 = vphi %v689_v4, %v804_v4  }
   0x6   : > { %484 = vmatpush3.msra.mxu0 %v672_v0  ;;  %508 = vmatpush3.msra.mxu1 %v672_v0  ;;  %s230_s9 = scalar_lea.vmem %s796_s0, %s747_s4  ;;  %s263_s12 = scalar_lea.vmem %s797_s1, %s747_s4 }
   0x7   : > { %485 = vmatprep.mubr.msk.f32.mxu0 %vm46_vm0, %v623_v7  ;;  %488 = vmatprep.mubr.msk.f32.mxu1 %vm46_vm0, %v615_v5  ;;  %v232_v8 = vld [vmem:[%s230_s9 + $0x8] sm:$0xff]  ;;  %v234_v9 = vld [vmem:[%s230_s9 + $0x18] sm:$0xff]  ;;  %v231_v12 = vld [vmem:[%s230_s9] sm:$0xff]  ;;  %s296_s15 = scalar_lea.vmem %s798_s2, %s747_s4  ;;  %p38_p0 = scmp.ge.s32.totalorder %s41_s3, 3  }
   0x8   : > { %486 = vmatmul.mubr.msk.f32.vlgmr.msra.gmra.mxu0 %vm46_vm0, %v619_v6  ;;  %489 = vmatmul.mubr.msk.f32.vlgmr.msra.gmra.mxu1 %vm46_vm0, %v611_v4  ;;  %v233_v13 = vld [vmem:[%s230_s9 + $0x10] sm:$0xff]  ;;  %v265_v23 = vld [vmem:[%s263_s12 + $0x8] sm:$0xff]  ;;  %v264_v27 = vld [vmem:[%s263_s12] sm:$0xff] }
   0x9   : > { %491 = vmatprep.subr.mxu1 %v677_v1  ;;  %493 = vmatprep.mubr.msk.f32.mxu1 %vm46_vm0, %v623_v7  ;;  %v267_v28 = vld [vmem:[%s263_s12 + $0x18] sm:$0xff]  ;;  %v266_v31 = vld [vmem:[%s263_s12 + $0x10] sm:$0xff]  ;;  %v298_v63 = vld [vmem:[%s296_s15 + $0x8] sm:$0xff] }
   0xa   : > { %492 = vmatpush3.msra.mxu1 %v677_v1  ;;  %499 = vmatprep.subr.mxu0 %v682_v2 }
   0xb   : > { %500 = vmatpush3.msra.mxu0 %v682_v2  ;;  %501 = vmatprep.mubr.msk.f32.mxu0 %vm46_vm0, %v623_v7 }
   0xc   : > { %494 = vmatmul.mubr.msk.f32.vlgmr.msra.gmra.mxu1 %vm46_vm0, %v619_v6  ;;  %502 = vmatmul.mubr.msk.f32.vlgmr.msra.gmra.mxu0 %vm46_vm0, %v619_v6 }
   0xd   : > { %496 = vmatprep.mubr.msk.f32.mxu1 %vm46_vm0, %v615_v5  ;;  %504 = vmatprep.mubr.msk.f32.mxu0 %vm46_vm0, %v615_v5 }
  0x10   : > { %497 = vmatmul.mubr.msk.f32.gmra.mxu1 %vm46_vm0, %v611_v4  ;;  %505 = vmatmul.mubr.msk.f32.gmra.mxu0 %vm46_vm0, %v611_v4 }
  0xc8   : > { %v487_v10 = vpop.f32.mrf.mxu0  ;;  %v490_v11 = vpop.f32.mrf.mxu1 }
  0xc9   : > { %v236_v14 = vadd.f32 %v487_v10, %v232_v8  ;;  %v238_v15 = vadd.f32 %v490_v11, %v234_v9  ;;  %v300_v11 = vld [vmem:[%s296_s15 + $0x18] sm:$0xff] }
  0xca   : > { %v125_v16 = vpop.f32.mrf.mxu0  ;;  %v135_v17 = vpop.f32.mrf.mxu1 }
  0xcb   : > { %v457_v18 = vmul.f32 -1.442695, %v236_v14  ;;  %v459_v19 = vmul.f32 -1.442695, %v238_v15  ;;  %v235_v20 = vadd.f32 %v231_v12, %v125_v16  ;;  %v237_v21 = vadd.f32 %v233_v13, %v135_v17  ;;  %v297_v13 = vld [vmem:[%s296_s15] sm:$0xff] }
  0xcc   : > { %v495_v22 = vpop.f32.mrf.mxu1  ;;  %v503_v47 = vpop.f32.mrf.mxu0 }
  0xcd   : > { %549 = vpow2.f32 %v457_v18  ;;  %v456_v24 = vmul.f32 -1.442695, %v235_v20  ;;  %v458_v25 = vmul.f32 -1.442695, %v237_v21  ;;  %v269_v29 = vadd.f32 %v495_v22, %v265_v23 }
  0xce   : > { %551 = vpow2.f32 %v459_v19  ;;  %v210_v26 = vpop.f32.mrf.mxu1  ;;  %v367_v49 = vpop.f32.mrf.mxu0  ;;  %v373_v59 = vadd.f32 %v503_v47, %v687_v3  ;;  %v299_v19 = vld [vmem:[%s296_s15 + $0x10] sm:$0xff] }
  0xcf   : > { %553 = vpow2.f32 %v456_v24  ;;  %v268_v32 = vadd.f32 %v264_v27, %v210_v26  ;;  %v461_v35 = vmul.f32 -1.442695, %v269_v29  ;;  %v368_v10 = vadd.f32 %v687_v3, %v367_v49 }
  0xd0   : > { %555 = vpow2.f32 %v458_v25  ;;  %v498_v30 = vpop.f32.mrf.mxu1  ;;  %v506_v52 = vpop.f32.mrf.mxu0 }
  0xd1   : > { %v271_v33 = vadd.f32 %v498_v30, %v267_v28  ;;  %v460_v38 = vmul.f32 -1.442695, %v268_v32  ;;  %v383_v57 = vadd.f32 %v506_v52, %v687_v3 }
  0xd2   : > { %v220_v34 = vpop.f32.mrf.mxu1  ;;  %v377_v60 = vpop.f32.mrf.mxu0 }
  0xd3   : > { %v463_v36 = vmul.f32 -1.442695, %v271_v33  ;;  %v270_v37 = vadd.f32 %v266_v31, %v220_v34  ;;  %v378_v15 = vadd.f32 %v687_v3, %v377_v60 }
  0xd5   : > { %557 = vpow2.f32 %v463_v36  ;;  %v462_v39 = vmul.f32 -1.442695, %v270_v37 }
  0xd6   : > { %559 = vpow2.f32 %v461_v35 }
  0xd7   : > { %561 = vpow2.f32 %v460_v38 }
  0xd8   : > { %563 = vpow2.f32 %v462_v39 }
  0xda   : > { %v550_v40 = vpop.eup %549 }
  0xdb   : > { %v552_v41 = vpop.eup %551  ;;  %v252_v42 = vadd.f32 1.0, %v550_v40 }
  0xdc   : > { %v554_v43 = vpop.eup %553  ;;  %v254_v44 = vadd.f32 1.0, %v552_v41 }
  0xdd   : > { %v556_v45 = vpop.eup %555  ;;  %565 = vrcp.f32 %v252_v42  ;;  %v251_v46 = vadd.f32 1.0, %v554_v43 }
  0xde   : > { %567 = vrcp.f32 %v254_v44  ;;  %v253_v48 = vadd.f32 1.0, %v556_v45 }
  0xdf   : > { %569 = vrcp.f32 %v251_v46 }
  0xe0   : > { %571 = vrcp.f32 %v253_v48 }
  0xe2   : > { %v558_v50 = vpop.eup %557 }
  0xe3   : > { %v560_v51 = vpop.eup %559  ;;  %v287_v54 = vadd.f32 1.0, %v558_v50 }
  0xe4   : > { %v562_v53 = vpop.eup %561  ;;  %v285_v56 = vadd.f32 1.0, %v560_v51 }
  0xe5   : > { %v564_v55 = vpop.eup %563  ;;  %v284_v58 = vadd.f32 1.0, %v562_v53  ;;  %573 = vrcp.f32 %v287_v54 }
  0xe6   : > { %v286_v62 = vadd.f32 1.0, %v564_v55  ;;  %575 = vrcp.f32 %v285_v56 }
  0xe7   : > { %577 = vrcp.f32 %v284_v58 }
  0xe8   : > { %579 = vrcp.f32 %v286_v62 }
  0xea   : > { %v566_v61 = vpop.eup %565 }
  0xeb   : > { %v568_v8 = vpop.eup %567  ;;  %v387_v9 = vmul.f32 %v566_v61, %v373_v59 }
  0xec   : > { %v570_v12 = vpop.eup %569  ;;  %v389_v14 = vmul.f32 %v568_v8, %v383_v57 }
  0xed   : > { %v572_v16 = vpop.eup %571  ;;  %v391_v17 = vadd.f32 %v387_v9, %v298_v63  ;;  %v386_v18 = vmul.f32 %v570_v12, %v368_v10 }
  0xee   : > { %v393_v20 = vadd.f32 %v389_v14, %v300_v11  ;;  %v388_v21 = vmul.f32 %v572_v16, %v378_v15 }
  0xef   : > { %581 = vtanh.f32 %v391_v17  ;;  %v390_v22 = vadd.f32 %v386_v18, %v297_v13 }
  0xf0   : > { %583 = vtanh.f32 %v393_v20  ;;  %v392_v23 = vadd.f32 %v388_v21, %v299_v19 }
  0xf1   : > { %585 = vtanh.f32 %v390_v22 }
  0xf2   : > { %587 = vtanh.f32 %v392_v23  ;;  %v574_v24 = vpop.eup %573 }
  0xf3   : > { %v576_v25 = vpop.eup %575  ;;  %v401_v27 = vsub.f32 1.0, %v574_v24  ;;  %v409_v36 = vmul.f32 %v611_v4, %v574_v24 }
  0xf4   : > { %v578_v26 = vpop.eup %577  ;;  %v399_v29 = vsub.f32 1.0, %v576_v25  ;;  %v407_v32 = vmul.f32 %v619_v6, %v576_v25 }
  0xf5   : > { %v580_v28 = vpop.eup %579  ;;  %v398_v33 = vsub.f32 1.0, %v578_v26  ;;  %v406_v40 = vmul.f32 %v623_v7, %v578_v26 }
  0xf6   : > { %v400_v37 = vsub.f32 1.0, %v580_v28  ;;  %v408_v43 = vmul.f32 %v615_v5, %v580_v28 }
  0xfc   : > { %v582_v30 = vpop.eup %581 }
  0xfd   : > { %v584_v31 = vpop.eup %583  ;;  %v403_v34 = vmul.f32 %v582_v30, %v399_v29 }
  0xfe   : > { %v586_v35 = vpop.eup %585  ;;  %v405_v38 = vmul.f32 %v584_v31, %v401_v27 }
  0xff   : > { %v588_v39 = vpop.eup %587  ;;  %v411_v41 = vadd.f32 %v407_v32, %v403_v34   ;;  %v402_v42 = vmul.f32 %v586_v35, %v398_v33 }
 0x100   : > { %v413_v44 = vadd.f32 %v409_v36, %v405_v38   ;;  %v404_v45 = vmul.f32 %v588_v39, %v400_v37  ;;  %40 = sbr.rel (!%p38_p0) target bundleno = 5 (0x5), region = 58 }
 0x101   : > { %v410_v46 = vadd.f32 %v406_v40, %v402_v42   ;;  %v806_v6 = vmov %v411_v41  ;;  %416 = vst.msk [vmem:[%s803_s7 + $0x8] sm:$0xff] (%p38_p0), %vm46_vm0, %v411_v41 }
 0x102   : > { %v412_v47 = vadd.f32 %v408_v43, %v404_v45   ;;  %v804_v4 = vmov %v413_v44  ;;  %418 = vst.msk [vmem:[%s803_s7 + $0x18] sm:$0xff] (%p38_p0), %vm46_vm0, %v413_v44 }
 0x103   : > { %v807_v7 = vmov %v410_v46  ;;  %415 = vst.msk [vmem:[%s803_s7] sm:$0xff] (%p38_p0), %vm46_vm0, %v410_v46 }
 0x104   : > { %v805_v5 = vmov %v412_v47  ;;  %417 = vst.msk [vmem:[%s803_s7 + $0x10] sm:$0xff] (%p38_p0), %vm46_vm0, %v412_v47 }

// kernel: _lambda_.7
= control target key start
LH: loop header
LB: loop body
LE: loop exit
PB: predicated region body
PF: predicated region fallthrough
CT: control target
= control target key end

     0   :  { %12 = vsyncpa [#allocation4], 0  ;;  %s419_s0 = inlined_call_operand.vmem [shape: f32[2,16], index: 0, kind: input, shape index: {}]   ;;  %s420_s1 = inlined_call_operand.vmem [shape: f32[2,32], index: 1, kind: input, shape index: {}]   ;;  %s421_s2 = inlined_call_operand.vmem [shape: f32[16,8], index: 2, kind: input, shape index: {}]   ;;  %s422_s3 = inlined_call_operand.vmem [shape: f32[32,8], index: 3, kind: input, shape index: {}]   ;;  %s423_s4 = inlined_call_operand.vmem [shape: f32[1,8], index: 4, kind: input, shape index: {}]   ;;  %s424_s5 = inlined_call_operand.vmem [shape: f32[4,2,8], index: 5, kind: input, shape index: {}]   ;;  %s425_s6 = inlined_call_operand.vmem [shape: f32[4], index: 6, kind: input, shape index: {}]   ;;  %s426_s7 = inlined_call_operand.hbm [shape: f32[2,8], index: 7, kind: output, shape index: {}]  }
   0x1   :  { %13 = vsyncpa [#allocation3], 0  ;;  %s32_s26 = sshll.u32 %s425_s6, 4  ;;  %s33_s26 = int_to_ptr.vmem [resolvable:$true] %s32_s26 }
   0x2   :  { %s294_s27 = scalar_lea.vmem %s33_s26, 16  ;;  %p299_p1 = scmp.lt.s32.totalorder %s33_s26, %s33_s26 }
   0x3   :  { %p295_p0 = scmp.ne.s32.totalorder %s33_s26, %s294_s27  ;;  %p300_p2 = scmp.lt.s32.totalorder %s294_s27, %s294_s27 }
   0x5   :  { %p301_p3 = por %p300_p2, %p299_p1 }
   0x7   :  { %p302_p4 = pnand %p301_p3, %p295_p0 }
   0x9   :  { %305 = shalt.err (!%p302_p4)
}
   0xa   :  { %s330_s28 = smov [#allocation2]  }
   0xb   :  { %35 = dma.vmem_to_smem %s33_s26, 16, %s330_s28, [#allocation4]  }
   0xc   :  { %326 = dma.done.wait [#allocation4], 16  }
   0xd   :  { %327 = vsyncadd [#allocation4], 4294967280 }
   0xe   :  { %39 = sfence }
   0xf   :  { %v47_v0 = vld [vmem:[%s422_s3 + $0x18] sm:$0xff]  ;;  %v42_v1 = vld [vmem:[%s421_s2 + $0x8] sm:$0xff]  ;;  %v331_v2 = vmov 0.0   ;;  %v46_v3 = vld [vmem:[%s422_s3 + $0x10] sm:$0xff]  ;;  %vm122_vm0 = vcmask 130048   ;;  %vm332_vm1 = vmmov 0  }
  0x10   :  { %268 = vmatprep.subr.mxu0 %v331_v2  ;;  %279 = vmatprep.subr.mxu1 %v331_v2  ;;  %v41_v4 = vld [vmem:[%s421_s2] sm:$0xff]  ;;  %v45_v5 = vld [vmem:[%s422_s3 + $0x8] sm:$0xff]  ;;  %vm48_vm2 = vcmask 261120   ;;  %s252_s20 = sld [smem:[#allocation2 + $0x1]]  ;;  %vm233_vm3 = vcmask 58368  }
  0x11   :  { %269 = vmatpush3.msra.mxu0 %v47_v0  ;;  %280 = vmatpush3.msra.mxu1 %v42_v1  ;;  %v40_v6 = vld [vmem:[%s419_s0] sm:$0x3]  ;;  %s196_s0 = sld [smem:[#allocation2]]  ;;  %v253_v11 = vld [vmem:[%s424_s5 + $0x2] sm:$0x3] }
  0x12   :  { %270 = vmatprep.subr.mxu0 %v331_v2  ;;  %281 = vmatprep.subr.mxu1 %v331_v2  ;;  %v44_v7 = vld [vmem:[%s422_s3] sm:$0xff]  ;;  %s254_s21 = sld [smem:[#allocation2 + $0x2]] }
  0x13   :  { %271 = vmatpush3.msra.mxu0 %v46_v3  ;;  %282 = vmatpush3.msra.mxu1 %v41_v4  ;;  %v43_v8 = vld [vmem:[%s420_s1] sm:$0x3]  ;;  %s256_s25 = sld [smem:[#allocation2 + $0x3]]  ;;  %v255_v15 = vld [vmem:[%s424_s5 + $0x4] sm:$0x3] }
  0x14   :  { %272 = vmatprep.subr.mxu0 %v331_v2  ;;  %283 = vmatprep.mubr.msk.f32.mxu1 %vm332_vm1, %v331_v2  ;;  %v197_v9 = vld [vmem:[%s424_s5] sm:$0x3]  ;;  %v257_v19 = vld [vmem:[%s424_s5 + $0x6] sm:$0x3]  ;;  %s333_s5 = smov [#allocation5]  }
  0x15   :  { %273 = vmatpush3.msra.mxu0 %v45_v5  ;;  %284 = vmatmul.mubr.msk.f32.vlgmr.msra.gmra.mxu1 %vm122_vm0, %v40_v6  ;;  %v258_v26 = vld [vmem:[%s423_s4] ss:$0 sm:$0xff]  ;;  %s241_s8 = sshll.u32 %s333_s5, 4  ;;  %s242_s8 = int_to_ptr.vmem [resolvable:$true] %s241_s8 }
  0x16   :  { %274 = vmatprep.subr.mxu0 %v331_v2  ;;  %276 = vmatprep.mubr.msk.f32.mxu0 %vm332_vm1, %v331_v2  ;;  %v203_v12 = vstv %s252_s20  ;;  %s306_s9 = scalar_lea.vmem %s242_s8, 32  ;;  %p311_p6 = scmp.lt.s32.totalorder %s242_s8, %s242_s8 }
  0x17   :  { %275 = vmatpush3.msra.mxu0 %v44_v7  ;;  %v198_v10 = vstv %s196_s0  ;;  %v204_v14 = vmul.f32 %v253_v11, %v203_v12  ;;  %p307_p5 = scmp.ne.s32.totalorder %s242_s8, %s306_s9  ;;  %p312_p7 = scmp.lt.s32.totalorder %s306_s9, %s306_s9 }
  0x18   :  { %277 = vmatmul.mubr.msk.f32.vlgmr.msra.gmra.mxu0 %vm48_vm2, %v43_v8  ;;  %v199_v13 = vmul.f32 %v198_v10, %v197_v9  ;;  %v209_v16 = vstv %s254_s21 }
  0x19   :  { %v210_v18 = vmul.f32 %v255_v15, %v209_v16  ;;  %v215_v20 = vstv %s256_s25  ;;  %p313_p8 = por %p312_p7, %p311_p6 }
  0x1a   :  { %v205_v17 = vadd.f32 %v204_v14, %v199_v13  ;;  %v216_v23 = vmul.f32 %v257_v19, %v215_v20 }
  0x1b   :  { %p314_p9 = pnand %p313_p8, %p307_p5 }
  0x1c   :  { %v211_v22 = vadd.f32 %v210_v18, %v205_v17 }
  0x1e   :  { %v217_v28 = vadd.f32 %v216_v23, %v211_v22 }
  0xd5   :  { %v192_v21 = vpop.f32.mrf.mxu1 }
  0xd7   :  { %v285_v24 = vpop.f32.mrf.mxu1 }
  0xd8   :  { %v118_v25 = vpop.f32.mrf.mxu0 }
  0xd9   :  { %v193_v27 = vadd.f32 %v192_v21, %v118_v25 }
  0xda   :  { %v278_v29 = vpop.f32.mrf.mxu0 }
  0xdb   :  { %v225_v30 = vadd.f32 %v258_v26, %v193_v27 }
  0xdd   :  { %v226_v31 = vadd.f32 %v225_v30, %v217_v28 }
  0xdf   :  { %v259_v32 = vmul.f32 -1.442695, %v226_v31 }
  0xe1   :  { %290 = vpow2.f32 %v259_v32 }
  0xee   :  { %v291_v33 = vpop.eup %290 }
  0xef   :  { %v230_v34 = vadd.f32 1.0, %v291_v33 }
  0xf1   :  { %292 = vrcp.f32 %v230_v34 }
  0xfe   :  { %v293_v35 = vpop.eup %292 }
  0xff   :  { %234 = vst.msk [vmem:[#allocation5] sm:$0x3] %vm233_vm3, %v293_v35 }
 0x100   :  { %317 = shalt.err (!%p314_p9)
}
 0x101   :  { %244 = dma.vmem_to_hbm [thread:$0]  %s242_s8, 32, %s426_s7, [#allocation3]  }
 0x102   :  { %328 = dma.done.wait [#allocation3], 32  }
 0x103   :  { %329 = vsyncadd [#allocation3], 4294967264 }
 0x104   :  { %248 = vsyncpa [#allocation3], 1 }
 0x105   :  { %249 = vsyncpa [#allocation4], 1 }

// kernel: _lambda_.4
= control target key start
LH: loop header
LB: loop body
LE: loop exit
PB: predicated region body
PF: predicated region fallthrough
CT: control target
= control target key end

     0   :  { %v2434_v0 = vmov 0.0   ;;  %vm45_vm0 = vcmask 64512   ;;  %vm2435_vm1 = vmmov 0   ;;  %vm784_vm2 = vcmask 130048   ;;  %s3534_s1 = inlined_call_operand.vmem [shape: f32[4,8,16], index: 1, kind: input, shape index: {}]   ;;  %s3535_s0 = inlined_call_operand.vmem [shape: f32[128,8], index: 0, kind: input, shape index: {}]   ;;  %s3536_s3 = inlined_call_operand.vmem [shape: f32[3,16,16], index: 3, kind: input, shape index: {}]   ;;  %s3537_s5 = inlined_call_operand.vmem [shape: f32[3,16,8], index: 5, kind: input, shape index: {}]   ;;  %s3538_s2 = inlined_call_operand.vmem [shape: f32[1,16], index: 2, kind: input, shape index: {}]   ;;  %s3539_s4 = inlined_call_operand.vmem [shape: f32[3,1,16], index: 4, kind: input, shape index: {}]   ;;  %s3540_s7 = inlined_call_operand.vmem [shape: f32[3,104,16], index: 7, kind: output, shape index: {0}]   ;;  %s3541_s6 = inlined_call_operand.vmem [shape: f32[3,1,8], index: 6, kind: input, shape index: {}]   ;;  %s3542_s8 = inlined_call_operand.vmem [shape: f32[3,96,8], index: 8, kind: output, shape index: {1}]  }
   0x1   :  { %2071 = vmatprep.subr.mxu0 %v2434_v0  ;;  %2430 = vmatprep.subr.mxu1 %v2434_v0  ;;  %v1729_v1 = vld [vmem:[%s3534_s1 + $0x8] sm:$0xff]  ;;  %v2492_v3 = vld [vmem:[%s3535_s0 + $0x58] sm:$0xff]  ;;  %v41_v4 = vld [vmem:[%s3534_s1] sm:$0xff] }
   0x2   :  { %v29_v2 = vld [vmem:[%s3535_s0 + $0x8] sm:$0xff]  ;;  %2072 = vmatpush3.msra.mxu0 %v1729_v1  ;;  %2431 = vmatpush3.msra.mxu1 %v1729_v1  ;;  %v30_v5 = vld [vmem:[%s3535_s0 + $0x10] sm:$0xff]  ;;  %v2513_v6 = vld [vmem:[%s3535_s0 + $0x60] sm:$0xff] }
   0x3   :  { %2073 = vmatprep.mubr.msk.f32.mxu0 %vm2435_vm1, %v2434_v0  ;;  %2103 = vmatprep.mubr.msk.f32.mxu1 %vm2435_vm1, %v2434_v0  ;;  %v1756_v7 = vld [vmem:[%s3534_s1 + $0x10] sm:$0xff]  ;;  %v2532_v8 = vld [vmem:[%s3535_s0 + $0x18] sm:$0xff]  ;;  %v2537_v9 = vld [vmem:[%s3535_s0 + $0x68] sm:$0xff] }
   0x4   :  { %2074 = vmatmul.mubr.msk.f32.vlgmr.msra.gmra.mxu0 %vm45_vm0, %v29_v2  ;;  %2104 = vmatmul.mubr.msk.f32.vlgmr.msra.gmra.mxu1 %vm45_vm0, %v2492_v3  ;;  %v2551_v10 = vld [vmem:[%s3535_s0 + $0x20] sm:$0xff]  ;;  %v1770_v12 = vld [vmem:[%s3534_s1 + $0x18] sm:$0xff]  ;;  %v2567_v13 = vld [vmem:[%s3535_s0 + $0x28] sm:$0xff] }
   0x5   :  { %2112 = vmatprep.subr.mxu1 %v2434_v0  ;;  %2076 = vmatprep.mubr.msk.f32.mxu0 %vm2435_vm1, %v2434_v0  ;;  %v28_v11 = vld [vmem:[%s3535_s0] sm:$0xff]  ;;  %v34_v14 = vld [vmem:[%s3535_s0 + $0x30] sm:$0xff]  ;;  %v35_v15 = vld [vmem:[%s3535_s0 + $0x38] sm:$0xff] }
   0x6   :  { %2113 = vmatpush3.msra.mxu1 %v41_v4  ;;  %2106 = vmatprep.mubr.msk.f32.mxu1 %vm2435_vm1, %v2434_v0  ;;  %v36_v16 = vld [vmem:[%s3535_s0 + $0x40] sm:$0xff]  ;;  %v37_v17 = vld [vmem:[%s3535_s0 + $0x48] sm:$0xff]  ;;  %v38_v18 = vld [vmem:[%s3535_s0 + $0x50] sm:$0xff] }
   0x7   :  { %2194 = vmatprep.subr.mxu1 %v2434_v0  ;;  %2153 = vmatprep.subr.mxu0 %v2434_v0  ;;  %v360_v19 = vld [vmem:[%s3535_s0 + $0x70] sm:$0xff]  ;;  %v776_v20 = vld [vmem:[%s3536_s3 + $0x8] sm:$0xff]  ;;  %v557_v21 = vld [vmem:[%s3535_s0 + $0x78] sm:$0xff] }
   0x8   :  { %2077 = vmatmul.mubr.msk.f32.gmra.mxu0 %vm45_vm0, %v30_v5  ;;  %2107 = vmatmul.mubr.msk.f32.gmra.mxu1 %vm45_vm0, %v2513_v6  ;;  %v968_v22 = vld [vmem:[%s3537_s5 + $0x8] sm:$0xff]  ;;  %v775_v23 = vld [vmem:[%s3536_s3] sm:$0xff]  ;;  %v2756_v25 = vld [vmem:[%s3537_s5 + $0x18] sm:$0xff] }
   0x9   :  { %2079 = vmatprep.mubr.msk.f32.mxu0 %vm2435_vm1, %v2434_v0  ;;  %2109 = vmatprep.mubr.msk.f32.mxu1 %vm2435_vm1, %v2434_v0  ;;  %v967_v24 = vld [vmem:[%s3537_s5] sm:$0xff] }
   0xa   :  { %2154 = vmatpush3.msra.mxu0 %v1756_v7 }
   0xb   :  { %2235 = vmatprep.subr.mxu0 %v2434_v0 }
   0xc   :  { %2080 = vmatmul.mubr.msk.f32.gmra.mxu0 %vm45_vm0, %v2532_v8  ;;  %2110 = vmatmul.mubr.msk.f32.gmra.mxu1 %vm45_vm0, %v2537_v9 }
   0xd   :  { %2082 = vmatprep.mubr.msk.f32.mxu0 %vm2435_vm1, %v2434_v0  ;;  %2114 = vmatprep.mubr.msk.f32.mxu1 %vm2435_vm1, %v2434_v0 }
  0x10   :  { %2083 = vmatmul.mubr.msk.f32.gmra.mxu0 %vm45_vm0, %v2551_v10  ;;  %2115 = vmatmul.mubr.msk.f32.vlgmr.msra.gmra.mxu1 %vm45_vm0, %v28_v11 }
  0x11   :  { %2195 = vmatpush3.msra.mxu1 %v1770_v12  ;;  %2085 = vmatprep.mubr.msk.f32.mxu0 %vm2435_vm1, %v2434_v0 }
  0x12   :  { %2117 = vmatprep.mubr.msk.f32.mxu1 %vm2435_vm1, %v2434_v0  ;;  %2278 = vmatprep.subr.mxu1 %v968_v22 }
  0x14   :  { %2086 = vmatmul.mubr.msk.f32.gmra.mxu0 %vm45_vm0, %v2567_v13  ;;  %2118 = vmatmul.mubr.msk.f32.gmra.mxu1 %vm45_vm0, %v29_v2 }
  0x15   :  { %2088 = vmatprep.mubr.msk.f32.mxu0 %vm2435_vm1, %v2434_v0  ;;  %2120 = vmatprep.mubr.msk.f32.mxu1 %vm2435_vm1, %v2434_v0 }
  0x18   :  { %2089 = vmatmul.mubr.msk.f32.gmra.mxu0 %vm45_vm0, %v34_v14  ;;  %2121 = vmatmul.mubr.msk.f32.gmra.mxu1 %vm45_vm0, %v30_v5 }
  0x19   :  { %2091 = vmatprep.mubr.msk.f32.mxu0 %vm2435_vm1, %v2434_v0  ;;  %2123 = vmatprep.mubr.msk.f32.mxu1 %vm2435_vm1, %v2434_v0 }
  0x1c   :  { %2092 = vmatmul.mubr.msk.f32.gmra.mxu0 %vm45_vm0, %v35_v15  ;;  %2124 = vmatmul.mubr.msk.f32.gmra.mxu1 %vm45_vm0, %v2532_v8 }
  0x1d   :  { %2094 = vmatprep.mubr.msk.f32.mxu0 %vm2435_vm1, %v2434_v0  ;;  %2126 = vmatprep.mubr.msk.f32.mxu1 %vm2435_vm1, %v2434_v0 }
  0x20   :  { %2095 = vmatmul.mubr.msk.f32.gmra.mxu0 %vm45_vm0, %v36_v16  ;;  %2127 = vmatmul.mubr.msk.f32.gmra.mxu1 %vm45_vm0, %v2551_v10 }
  0x21   :  { %2097 = vmatprep.mubr.msk.f32.mxu0 %vm2435_vm1, %v2434_v0  ;;  %2129 = vmatprep.mubr.msk.f32.mxu1 %vm2435_vm1, %v2434_v0 }
  0x24   :  { %2098 = vmatmul.mubr.msk.f32.gmra.mxu0 %vm45_vm0, %v37_v17  ;;  %2130 = vmatmul.mubr.msk.f32.gmra.mxu1 %vm45_vm0, %v2567_v13 }
  0x25   :  { %2100 = vmatprep.mubr.msk.f32.mxu0 %vm2435_vm1, %v2434_v0  ;;  %2132 = vmatprep.mubr.msk.f32.mxu1 %vm2435_vm1, %v2434_v0 }
  0x28   :  { %2101 = vmatmul.mubr.msk.f32.gmra.mxu0 %vm45_vm0, %v38_v18  ;;  %2133 = vmatmul.mubr.msk.f32.gmra.mxu1 %vm45_vm0, %v34_v14 }
  0x29   :  { %2135 = vmatprep.mubr.msk.f32.mxu1 %vm2435_vm1, %v2434_v0  ;;  %2155 = vmatprep.mubr.msk.f32.mxu0 %vm2435_vm1, %v2434_v0 }
  0x2c   :  { %2136 = vmatmul.mubr.msk.f32.gmra.mxu1 %vm45_vm0, %v35_v15  ;;  %2156 = vmatmul.mubr.msk.f32.vlgmr.msra.gmra.mxu0 %vm45_vm0, %v30_v5 }
  0x2d   :  { %2138 = vmatprep.mubr.msk.f32.mxu1 %vm2435_vm1, %v2434_v0  ;;  %2158 = vmatprep.mubr.msk.f32.mxu0 %vm2435_vm1, %v2434_v0 }
  0x2e   :  { %2236 = vmatpush3.msra.mxu0 %v776_v20 }
  0x2f   :  { %2237 = vmatprep.subr.mxu0 %v2434_v0 }
  0x30   :  { %2139 = vmatmul.mubr.msk.f32.gmra.mxu1 %vm45_vm0, %v36_v16  ;;  %2159 = vmatmul.mubr.msk.f32.gmra.mxu0 %vm45_vm0, %v2532_v8 }
  0x31   :  { %2141 = vmatprep.mubr.msk.f32.mxu1 %vm2435_vm1, %v2434_v0  ;;  %2161 = vmatprep.mubr.msk.f32.mxu0 %vm2435_vm1, %v2434_v0 }
  0x32   :  { %2238 = vmatpush3.msra.mxu0 %v775_v23 }
  0x33   :  { %2343 = vmatprep.subr.mxu0 %v2756_v25 }
  0x34   :  { %2142 = vmatmul.mubr.msk.f32.gmra.mxu1 %vm45_vm0, %v37_v17  ;;  %2162 = vmatmul.mubr.msk.f32.gmra.mxu0 %vm45_vm0, %v2551_v10 }
  0x35   :  { %2144 = vmatprep.mubr.msk.f32.mxu1 %vm2435_vm1, %v2434_v0  ;;  %2164 = vmatprep.mubr.msk.f32.mxu0 %vm2435_vm1, %v2434_v0 }
  0x38   :  { %2145 = vmatmul.mubr.msk.f32.gmra.mxu1 %vm45_vm0, %v38_v18  ;;  %2165 = vmatmul.mubr.msk.f32.gmra.mxu0 %vm45_vm0, %v2567_v13 }
  0x39   :  { %2147 = vmatprep.mubr.msk.f32.mxu1 %vm2435_vm1, %v2434_v0  ;;  %2167 = vmatprep.mubr.msk.f32.mxu0 %vm2435_vm1, %v2434_v0 }
  0x3c   :  { %2148 = vmatmul.mubr.msk.f32.gmra.mxu1 %vm45_vm0, %v2492_v3  ;;  %2168 = vmatmul.mubr.msk.f32.gmra.mxu0 %vm45_vm0, %v34_v14 }
  0x3d   :  { %2150 = vmatprep.mubr.msk.f32.mxu1 %vm2435_vm1, %v2434_v0  ;;  %2170 = vmatprep.mubr.msk.f32.mxu0 %vm2435_vm1, %v2434_v0 }
  0x40   :  { %2151 = vmatmul.mubr.msk.f32.gmra.mxu1 %vm45_vm0, %v2513_v6  ;;  %2171 = vmatmul.mubr.msk.f32.gmra.mxu0 %vm45_vm0, %v35_v15 }
  0x41   :  { %2173 = vmatprep.mubr.msk.f32.mxu0 %vm2435_vm1, %v2434_v0  ;;  %2196 = vmatprep.mubr.msk.f32.mxu1 %vm2435_vm1, %v2434_v0 }
  0x44   :  { %2174 = vmatmul.mubr.msk.f32.gmra.mxu0 %vm45_vm0, %v36_v16  ;;  %2197 = vmatmul.mubr.msk.f32.vlgmr.msra.gmra.mxu1 %vm45_vm0, %v2532_v8 }
  0x45   :  { %2176 = vmatprep.mubr.msk.f32.mxu0 %vm2435_vm1, %v2434_v0  ;;  %2199 = vmatprep.mubr.msk.f32.mxu1 %vm2435_vm1, %v2434_v0 }
  0x46   :  { %2279 = vmatpush3.msra.mxu1 %v968_v22 }
  0x47   :  { %2280 = vmatprep.subr.mxu1 %v967_v24 }
  0x48   :  { %2177 = vmatmul.mubr.msk.f32.gmra.mxu0 %vm45_vm0, %v37_v17  ;;  %2200 = vmatmul.mubr.msk.f32.gmra.mxu1 %vm45_vm0, %v2551_v10 }
  0x49   :  { %2179 = vmatprep.mubr.msk.f32.mxu0 %vm2435_vm1, %v2434_v0  ;;  %2202 = vmatprep.mubr.msk.f32.mxu1 %vm2435_vm1, %v2434_v0 }
  0x4a   :  { %2281 = vmatpush3.msra.mxu1 %v967_v24 }
  0x4b   :  { %2300 = vmatprep.subr.mxu1 %v2434_v0 }
  0x4c   :  { %2180 = vmatmul.mubr.msk.f32.gmra.mxu0 %vm45_vm0, %v38_v18  ;;  %2203 = vmatmul.mubr.msk.f32.gmra.mxu1 %vm45_vm0, %v2567_v13 }
  0x4d   :  { %2182 = vmatprep.mubr.msk.f32.mxu0 %vm2435_vm1, %v2434_v0  ;;  %2205 = vmatprep.mubr.msk.f32.mxu1 %vm2435_vm1, %v2434_v0 }
  0x50   :  { %2183 = vmatmul.mubr.msk.f32.gmra.mxu0 %vm45_vm0, %v2492_v3  ;;  %2206 = vmatmul.mubr.msk.f32.gmra.mxu1 %vm45_vm0, %v34_v14 }
  0x51   :  { %2185 = vmatprep.mubr.msk.f32.mxu0 %vm2435_vm1, %v2434_v0  ;;  %2208 = vmatprep.mubr.msk.f32.mxu1 %vm2435_vm1, %v2434_v0 }
  0x54   :  { %2186 = vmatmul.mubr.msk.f32.gmra.mxu0 %vm45_vm0, %v2513_v6  ;;  %2209 = vmatmul.mubr.msk.f32.gmra.mxu1 %vm45_vm0, %v35_v15 }
  0x55   :  { %2188 = vmatprep.mubr.msk.f32.mxu0 %vm2435_vm1, %v2434_v0  ;;  %2211 = vmatprep.mubr.msk.f32.mxu1 %vm2435_vm1, %v2434_v0 }
  0x58   :  { %2189 = vmatmul.mubr.msk.f32.gmra.mxu0 %vm45_vm0, %v2537_v9  ;;  %2212 = vmatmul.mubr.msk.f32.gmra.mxu1 %vm45_vm0, %v36_v16 }
  0x59   :  { %2191 = vmatprep.mubr.msk.f32.mxu0 %vm2435_vm1, %v2434_v0  ;;  %2214 = vmatprep.mubr.msk.f32.mxu1 %vm2435_vm1, %v2434_v0 }
  0x5c   :  { %2192 = vmatmul.mubr.msk.f32.gmra.mxu0 %vm45_vm0, %v360_v19  ;;  %2215 = vmatmul.mubr.msk.f32.gmra.mxu1 %vm45_vm0, %v37_v17 }
  0x5d   :  { %2217 = vmatprep.mubr.msk.f32.mxu1 %vm2435_vm1, %v2434_v0  ;;  %2239 = vmatprep.mubr.msk.f32.mxu0 %vm2435_vm1, %v2434_v0 }
  0x60   :  { %2218 = vmatmul.mubr.msk.f32.gmra.mxu1 %vm45_vm0, %v38_v18 }
  0x61   :  { %2220 = vmatprep.mubr.msk.f32.mxu1 %vm2435_vm1, %v2434_v0 }
  0x64   :  { %2221 = vmatmul.mubr.msk.f32.gmra.mxu1 %vm45_vm0, %v2492_v3 }
  0x65   :  { %2223 = vmatprep.mubr.msk.f32.mxu1 %vm2435_vm1, %v2434_v0 }
  0x68   :  { %2224 = vmatmul.mubr.msk.f32.gmra.mxu1 %vm45_vm0, %v2513_v6 }
  0x69   :  { %2226 = vmatprep.mubr.msk.f32.mxu1 %vm2435_vm1, %v2434_v0 }
  0x6c   :  { %2227 = vmatmul.mubr.msk.f32.gmra.mxu1 %vm45_vm0, %v2537_v9 }
  0x6d   :  { %2229 = vmatprep.mubr.msk.f32.mxu1 %vm2435_vm1, %v2434_v0 }
  0x70   :  { %2230 = vmatmul.mubr.msk.f32.gmra.mxu1 %vm45_vm0, %v360_v19 }
  0x71   :  { %2232 = vmatprep.mubr.msk.f32.mxu1 %vm2435_vm1, %v2434_v0 }
  0x74   :  { %2233 = vmatmul.mubr.msk.f32.gmra.mxu1 %vm45_vm0, %v557_v21 }
  0xc4   :  { %v151_v26 = vpop.f32.mrf.mxu0  ;;  %v2760_v27 = vpop.f32.mrf.mxu1 }
  0xc6   :  { %v2075_v28 = vpop.f32.mrf.mxu0  ;;  %v2105_v29 = vpop.f32.mrf.mxu1 }
  0xc8   :  { %v2762_v30 = vpop.f32.mrf.mxu0  ;;  %v2764_v31 = vpop.f32.mrf.mxu1 }
  0xca   :  { %v2078_v32 = vpop.f32.mrf.mxu0  ;;  %v2108_v33 = vpop.f32.mrf.mxu1 }
  0xcc   :  { %v2766_v34 = vpop.f32.mrf.mxu0  ;;  %v2768_v35 = vpop.f32.mrf.mxu1 }
  0xce   :  { %v2081_v36 = vpop.f32.mrf.mxu0  ;;  %v2111_v37 = vpop.f32.mrf.mxu1 }
  0xd0   :  { %v2770_v38 = vpop.f32.mrf.mxu0  ;;  %v284_v39 = vpop.f32.mrf.mxu1 }
  0xd1   :  { %v285_v28 = vadd.f32 %v284_v39, %v151_v26 }
  0xd2   :  { %v2084_v40 = vpop.f32.mrf.mxu0  ;;  %v2116_v41 = vpop.f32.mrf.mxu1 }
  0xd3   :  { %v2811_v40 = vld [vmem:[%s3538_s2] ss:$0 sm:$0xff] }
  0xd4   :  { %v2772_v42 = vpop.f32.mrf.mxu0  ;;  %v289_v43 = vpop.f32.mrf.mxu1 }
  0xd5   :  { %v290_v41 = vadd.f32 %v289_v43, %v2762_v30  ;;  %v1842_v30 = vld [vmem:[%s3537_s5 + $0x10] sm:$0xff] }
  0xd6   :  { %v2087_v44 = vpop.f32.mrf.mxu0  ;;  %v2119_v45 = vpop.f32.mrf.mxu1 }
  0xd8   :  { %v2774_v46 = vpop.f32.mrf.mxu0  ;;  %v294_v47 = vpop.f32.mrf.mxu1 }
  0xda   :  { %v2090_v48 = vpop.f32.mrf.mxu0  ;;  %v2122_v49 = vpop.f32.mrf.mxu1 }
  0xdc   :  { %v2776_v50 = vpop.f32.mrf.mxu0  ;;  %v2778_v51 = vpop.f32.mrf.mxu1 }
  0xde   :  { %v2093_v52 = vpop.f32.mrf.mxu0  ;;  %v2125_v53 = vpop.f32.mrf.mxu1 }
  0xdf   :  { %v295_v53 = vadd.f32 %v294_v47, %v2766_v34  ;;  %v300_v34 = vadd.f32 %v2778_v51, %v2770_v38 }
  0xe0   :  { %v2780_v54 = vpop.f32.mrf.mxu0  ;;  %v2782_v55 = vpop.f32.mrf.mxu1 }
  0xe1   :  { %v305_v38 = vadd.f32 %v2782_v55, %v2772_v42  ;;  %v1812_v42 = vld [vmem:[%s3536_s3 + $0x10] sm:$0xff] }
  0xe2   :  { %v2096_v56 = vpop.f32.mrf.mxu0  ;;  %v2128_v57 = vpop.f32.mrf.mxu1 }
  0xe4   :  { %v2784_v58 = vpop.f32.mrf.mxu0  ;;  %v2786_v59 = vpop.f32.mrf.mxu1 }
  0xe6   :  { %v2099_v60 = vpop.f32.mrf.mxu0  ;;  %v2131_v61 = vpop.f32.mrf.mxu1 }
  0xe8   :  { %v2788_v62 = vpop.f32.mrf.mxu0  ;;  %v2790_v63 = vpop.f32.mrf.mxu1 }
  0xea   :  { %v2102_v1 = vpop.f32.mrf.mxu0  ;;  %v2134_v2 = vpop.f32.mrf.mxu1 }
  0xec   :  { %v2792_v3 = vpop.f32.mrf.mxu1  ;;  %v468_v4 = vpop.f32.mrf.mxu0 }
  0xed   :  { %v532_v33 = vadd.f32 %v468_v4, %v285_v28 }
  0xee   :  { %v2137_v5 = vpop.f32.mrf.mxu1  ;;  %v2157_v6 = vpop.f32.mrf.mxu0 }
  0xf0   :  { %v2794_v7 = vpop.f32.mrf.mxu1  ;;  %v473_v8 = vpop.f32.mrf.mxu0 }
  0xf1   :  { %v533_v49 = vadd.f32 %v473_v8, %v290_v41 }
  0xf2   :  { %v2140_v9 = vpop.f32.mrf.mxu1  ;;  %v2160_v10 = vpop.f32.mrf.mxu0 }
  0xf4   :  { %v2796_v11 = vpop.f32.mrf.mxu1  ;;  %v478_v12 = vpop.f32.mrf.mxu0 }
  0xf5   :  { %v534_v43 = vadd.f32 %v478_v12, %v295_v53 }
  0xf6   :  { %v2143_v13 = vpop.f32.mrf.mxu1  ;;  %v2163_v14 = vpop.f32.mrf.mxu0 }
  0xf7   :  { %v1813_v14 = vld [vmem:[%s3536_s3 + $0x18] sm:$0xff] }
  0xf8   :  { %v2798_v15 = vpop.f32.mrf.mxu1  ;;  %v483_v16 = vpop.f32.mrf.mxu0 }
  0xf9   :  { %v535_v9 = vadd.f32 %v483_v16, %v300_v34 }
  0xfa   :  { %v2146_v17 = vpop.f32.mrf.mxu1  ;;  %v2166_v18 = vpop.f32.mrf.mxu0 }
  0xfc   :  { %v2800_v19 = vpop.f32.mrf.mxu1  ;;  %v488_v20 = vpop.f32.mrf.mxu0 }
  0xfd   :  { %v536_v18 = vadd.f32 %v488_v20, %v305_v38  ;;  %v310_v20 = vadd.f32 %v2786_v59, %v2774_v46 }
  0xfe   :  { %v2149_v21 = vpop.f32.mrf.mxu1  ;;  %v2169_v22 = vpop.f32.mrf.mxu0 }
 0x100   :  { %v2802_v23 = vpop.f32.mrf.mxu1  ;;  %v2804_v24 = vpop.f32.mrf.mxu0 }
 0x101   :  { %v537_v41 = vadd.f32 %v2804_v24, %v310_v20 }
 0x102   :  { %v2152_v29 = vpop.f32.mrf.mxu1  ;;  %v2172_v32 = vpop.f32.mrf.mxu0 }
 0x103   :  { %v2872_v32 = vld [vmem:[%s3537_s5 + $0x28] sm:$0xff] }
 0x104   :  { %v2806_v36 = vpop.f32.mrf.mxu0  ;;  %v665_v37 = vpop.f32.mrf.mxu1 }
 0x105   :  { %v729_v44 = vadd.f32 %v665_v37, %v532_v33 }
 0x106   :  { %v2175_v45 = vpop.f32.mrf.mxu0  ;;  %v2198_v48 = vpop.f32.mrf.mxu1 }
 0x107   :  { %v749_v52 = vadd.f32 %v2811_v40, %v729_v44  ;;  %v315_v45 = vadd.f32 %v2790_v63, %v2776_v50  ;;  %v320_v50 = vadd.f32 %v2792_v3, %v2780_v54  ;;  %v325_v54 = vadd.f32 %v2794_v7, %v2784_v58 }
 0x108   :  { %v2815_v26 = vpop.f32.mrf.mxu0  ;;  %v670_v39 = vpop.f32.mrf.mxu1  ;;  %v330_v58 = vadd.f32 %v2796_v11, %v2788_v62  ;;  %v335_v62 = vadd.f32 %v2798_v15, %v2760_v27  ;;  %v340_v27 = vadd.f32 %v2800_v19, %v2764_v31  ;;  %v345_v31 = vadd.f32 %v2802_v23, %v2768_v35 }
 0x109   :  { %v2818_v56 = vmax.f32 %v749_v52, 0.0  ;;  %v730_v57 = vadd.f32 %v670_v39, %v533_v49  ;;  %v538_v39 = vadd.f32 %v2806_v36, %v315_v45  ;;  %v1900_v45 = vld [vmem:[%s3537_s5 + $0x20] sm:$0xff] }
 0x10a   :  { %v2178_v60 = vpop.f32.mrf.mxu0  ;;  %v2201_v61 = vpop.f32.mrf.mxu1 }
 0x10b   :  { %v750_v1 = vadd.f32 %v2811_v40, %v730_v57  ;;  %2240 = vmatmul.mubr.msk.f32.vlgmr.msra.gmra.mxu0 %vm784_vm2, %v2818_v56 }
 0x10c   :  { %v2826_v2 = vpop.f32.mrf.mxu0  ;;  %v675_v4 = vpop.f32.mrf.mxu1  ;;  %2242 = vmatprep.mubr.msk.f32.mxu0 %vm2435_vm1, %v2434_v0  ;;  %2344 = vmatpush3.msra.mxu0 %v2756_v25 }
 0x10d   :  { %v2833_v47 = vmax.f32 %v750_v1, 0.0  ;;  %v731_v5 = vadd.f32 %v675_v4, %v534_v43  ;;  %2345 = vmatprep.subr.mxu0 %v1842_v30  ;;  %v539_v43 = vadd.f32 %v2815_v26, %v320_v50  ;;  %v540_v26 = vadd.f32 %v2826_v2, %v325_v54 }
 0x10e   :  { %v2181_v6 = vpop.f32.mrf.mxu0  ;;  %v2204_v8 = vpop.f32.mrf.mxu1  ;;  %2346 = vmatpush3.msra.mxu0 %v1842_v30 }
 0x10f   :  { %v751_v10 = vadd.f32 %v2811_v40, %v731_v5  ;;  %2243 = vmatmul.mubr.msk.f32.gmra.mxu0 %vm784_vm2, %v2833_v47  ;;  %2282 = vmatprep.mubr.msk.f32.mxu1 %vm784_vm2, %v2833_v47 }
 0x110   :  { %v2840_v25 = vpop.f32.mrf.mxu0  ;;  %v680_v12 = vpop.f32.mrf.mxu1  ;;  %2245 = vmatprep.mubr.msk.f32.mxu0 %vm2435_vm1, %v2434_v0  ;;  %2365 = vmatprep.subr.mxu0 %v2434_v0 }
 0x111   :  { %v2847_v51 = vmax.f32 %v751_v10, 0.0  ;;  %v732_v13 = vadd.f32 %v680_v12, %v535_v9  ;;  %v541_v2 = vadd.f32 %v2840_v25, %v330_v58 }
 0x112   :  { %v2184_v16 = vpop.f32.mrf.mxu0  ;;  %v2207_v17 = vpop.f32.mrf.mxu1 }
 0x113   :  { %v752_v21 = vadd.f32 %v2811_v40, %v732_v13  ;;  %2246 = vmatmul.mubr.msk.f32.gmra.mxu0 %vm784_vm2, %v2847_v51  ;;  %2283 = vmatmul.mubr.msk.f32.vlgmr.msra.gmra.mxu1 %vm784_vm2, %v2847_v51 }
 0x114   :  { %v2860_v55 = vpop.f32.mrf.mxu0  ;;  %v685_v22 = vpop.f32.mrf.mxu1  ;;  %2248 = vmatprep.mubr.msk.f32.mxu0 %vm2435_vm1, %v2434_v0  ;;  %2301 = vmatpush3.msra.mxu1 %v1813_v14 }
 0x115   :  { %v2866_v28 = vmax.f32 %v752_v21, 0.0  ;;  %v733_v29 = vadd.f32 %v685_v22, %v536_v18  ;;  %2302 = vmatprep.subr.mxu1 %v2434_v0  ;;  %v542_v25 = vadd.f32 %v2860_v55, %v335_v62 }
 0x116   :  { %v2187_v33 = vpop.f32.mrf.mxu0  ;;  %v2210_v37 = vpop.f32.mrf.mxu1  ;;  %2303 = vmatpush3.msra.mxu1 %v1812_v42 }
 0x117   :  { %v753_v44 = vadd.f32 %v2811_v40, %v733_v29  ;;  %2249 = vmatmul.mubr.msk.f32.gmra.mxu0 %vm784_vm2, %v2866_v28  ;;  %2285 = vmatprep.mubr.msk.f32.mxu1 %vm784_vm2, %v2866_v28 }
 0x118   :  { %v523_v46 = vpop.f32.mrf.mxu0  ;;  %v690_v59 = vpop.f32.mrf.mxu1  ;;  %2251 = vmatprep.mubr.msk.f32.mxu0 %vm2435_vm1, %v2434_v0  ;;  %2408 = vmatprep.subr.mxu1 %v2872_v32 }
 0x119   :  { %v2885_v48 = vmax.f32 %v753_v44, 0.0  ;;  %v734_v24 = vadd.f32 %v690_v59, %v537_v41  ;;  %v543_v42 = vadd.f32 %v523_v46, %v340_v27 }
 0x11a   :  { %v2190_v49 = vpop.f32.mrf.mxu0  ;;  %v2213_v52 = vpop.f32.mrf.mxu1 }
 0x11b   :  { %v754_v53 = vadd.f32 %v2811_v40, %v734_v24  ;;  %2252 = vmatmul.mubr.msk.f32.gmra.mxu0 %vm784_vm2, %v2885_v48  ;;  %2286 = vmatmul.mubr.msk.f32.gmra.mxu1 %vm784_vm2, %v2885_v48  ;;  %v1870_v24 = vld [vmem:[%s3536_s3 + $0x20] sm:$0xff] }
 0x11c   :  { %v528_v57 = vpop.f32.mrf.mxu0  ;;  %v695_v60 = vpop.f32.mrf.mxu1  ;;  %2254 = vmatprep.mubr.msk.f32.mxu0 %vm2435_vm1, %v2434_v0  ;;  %v3157_v49 = vld [vmem:[%s3541_s6] ss:$0 sm:$0xff] }
 0x11d   :  { %v2897_v63 = vmax.f32 %v754_v53, 0.0  ;;  %v735_v61 = vadd.f32 %v695_v60, %v538_v39  ;;  %v544_v33 = vadd.f32 %v528_v57, %v345_v31 }
 0x11e   :  { %v2216_v36 = vpop.f32.mrf.mxu1  ;;  %v2193_v30 = vpop.f32.mrf.mxu0 }
 0x11f   :  { %v755_v1 = vadd.f32 %v2811_v40, %v735_v61  ;;  %2255 = vmatmul.mubr.msk.f32.gmra.mxu0 %vm784_vm2, %v2897_v63  ;;  %2288 = vmatprep.mubr.msk.f32.mxu1 %vm784_vm2, %v2897_v63 }
 0x120   :  { %v700_v4 = vpop.f32.mrf.mxu1  ;;  %2257 = vmatprep.mubr.msk.f32.mxu0 %vm2435_vm1, %v2434_v0 }
 0x121   :  { %v2909_v3 = vmax.f32 %v755_v1, 0.0  ;;  %v736_v34 = vadd.f32 %v700_v4, %v539_v43 }
 0x122   :  { %v2219_v5 = vpop.f32.mrf.mxu1 }
 0x123   :  { %v756_v6 = vadd.f32 %v2811_v40, %v736_v34  ;;  %2258 = vmatmul.mubr.msk.f32.gmra.mxu0 %vm784_vm2, %v2909_v3  ;;  %2289 = vmatmul.mubr.msk.f32.gmra.mxu1 %vm784_vm2, %v2909_v3 }
 0x124   :  { %v705_v8 = vpop.f32.mrf.mxu1  ;;  %2260 = vmatprep.mubr.msk.f32.mxu0 %vm2435_vm1, %v2434_v0 }
 0x125   :  { %v2921_v7 = vmax.f32 %v756_v6, 0.0  ;;  %v737_v9 = vadd.f32 %v705_v8, %v540_v26 }
 0x126   :  { %v2222_v10 = vpop.f32.mrf.mxu1 }
 0x127   :  { %v757_v12 = vadd.f32 %v2811_v40, %v737_v9  ;;  %2261 = vmatmul.mubr.msk.f32.gmra.mxu0 %vm784_vm2, %v2921_v7  ;;  %2291 = vmatprep.mubr.msk.f32.mxu1 %vm784_vm2, %v2921_v7 }
 0x128   :  { %v710_v38 = vpop.f32.mrf.mxu1  ;;  %2263 = vmatprep.mubr.msk.f32.mxu0 %vm2435_vm1, %v2434_v0 }
 0x129   :  { %v2933_v11 = vmax.f32 %v757_v12, 0.0  ;;  %v738_v13 = vadd.f32 %v710_v38, %v541_v2 }
 0x12a   :  { %v2225_v14 = vpop.f32.mrf.mxu1 }
 0x12b   :  { %v758_v16 = vadd.f32 %v2811_v40, %v738_v13  ;;  %2264 = vmatmul.mubr.msk.f32.gmra.mxu0 %vm784_vm2, %v2933_v11  ;;  %2292 = vmatmul.mubr.msk.f32.gmra.mxu1 %vm784_vm2, %v2933_v11 }
 0x12c   :  { %v715_v17 = vpop.f32.mrf.mxu1  ;;  %2266 = vmatprep.mubr.msk.f32.mxu0 %vm2435_vm1, %v2434_v0 }
 0x12d   :  { %v2945_v15 = vmax.f32 %v758_v16, 0.0  ;;  %v739_v18 = vadd.f32 %v715_v17, %v542_v25 }
 0x12e   :  { %v2228_v21 = vpop.f32.mrf.mxu1 }
 0x12f   :  { %v759_v55 = vadd.f32 %v2811_v40, %v739_v18  ;;  %2267 = vmatmul.mubr.msk.f32.gmra.mxu0 %vm784_vm2, %v2945_v15  ;;  %2294 = vmatprep.mubr.msk.f32.mxu1 %vm784_vm2, %v2945_v15 }
 0x130   :  { %v720_v22 = vpop.f32.mrf.mxu1  ;;  %2269 = vmatprep.mubr.msk.f32.mxu0 %vm2435_vm1, %v2434_v0 }
 0x131   :  { %v2956_v19 = vmax.f32 %v759_v55, 0.0  ;;  %v740_v20 = vadd.f32 %v720_v22, %v543_v42 }
 0x132   :  { %v2231_v29 = vpop.f32.mrf.mxu1 }
 0x133   :  { %v760_v37 = vadd.f32 %v2811_v40, %v740_v20  ;;  %2270 = vmatmul.mubr.msk.f32.gmra.mxu0 %vm784_vm2, %v2956_v19  ;;  %2295 = vmatmul.mubr.msk.f32.gmra.mxu1 %vm784_vm2, %v2956_v19 }
 0x134   :  { %v725_v41 = vpop.f32.mrf.mxu1  ;;  %2272 = vmatprep.mubr.msk.f32.mxu0 %vm2435_vm1, %v2434_v0 }
 0x135   :  { %v2965_v44 = vmax.f32 %v760_v37, 0.0  ;;  %v741_v35 = vadd.f32 %v725_v41, %v544_v33 }
 0x136   :  { %v2234_v23 = vpop.f32.mrf.mxu1 }
 0x137   :  { %v761_v46 = vadd.f32 %v2811_v40, %v741_v35  ;;  %2273 = vmatmul.mubr.msk.f32.gmra.mxu0 %vm784_vm2, %v2965_v44  ;;  %2297 = vmatprep.mubr.msk.f32.mxu1 %vm784_vm2, %v2965_v44  ;;  %v1871_v40 = vld [vmem:[%s3536_s3 + $0x28] sm:$0xff] }
 0x138   :  { %2275 = vmatprep.mubr.msk.f32.mxu0 %vm2435_vm1, %v2434_v0 }
 0x139   :  { %v2974_v59 = vmax.f32 %v761_v46, 0.0 }
 0x13b   :  { %2276 = vmatmul.mubr.msk.f32.gmra.mxu0 %vm784_vm2, %v2974_v59  ;;  %2298 = vmatmul.mubr.msk.f32.gmra.mxu1 %vm784_vm2, %v2974_v59 }
 0x13c   :  { %2347 = vmatprep.mubr.msk.f32.mxu0 %vm784_vm2, %v2833_v47  ;;  %2304 = vmatprep.mubr.msk.f32.mxu1 %vm2435_vm1, %v2434_v0 }
 0x13f   :  { %2305 = vmatmul.mubr.msk.f32.vlgmr.msra.gmra.mxu1 %vm784_vm2, %v2818_v56  ;;  %2348 = vmatmul.mubr.msk.f32.vlgmr.msra.gmra.mxu0 %vm784_vm2, %v2847_v51 }
 0x140   :  { %2350 = vmatprep.mubr.msk.f32.mxu0 %vm784_vm2, %v2866_v28  ;;  %2409 = vmatpush3.msra.mxu1 %v2872_v32 }
 0x141   :  { %2307 = vmatprep.mubr.msk.f32.mxu1 %vm2435_vm1, %v2434_v0  ;;  %2366 = vmatpush3.msra.mxu0 %v1871_v40 }
 0x142   :  { %2367 = vmatprep.subr.mxu0 %v2434_v0  ;;  %2410 = vmatprep.subr.mxu1 %v1900_v45 }
 0x143   :  { %2308 = vmatmul.mubr.msk.f32.gmra.mxu1 %vm784_vm2, %v2833_v47  ;;  %2351 = vmatmul.mubr.msk.f32.gmra.mxu0 %vm784_vm2, %v2885_v48 }
 0x144   :  { %2353 = vmatprep.mubr.msk.f32.mxu0 %vm784_vm2, %v2897_v63  ;;  %2310 = vmatprep.mubr.msk.f32.mxu1 %vm2435_vm1, %v2434_v0 }
 0x145   :  { %2368 = vmatpush3.msra.mxu0 %v1870_v24  ;;  %2411 = vmatpush3.msra.mxu1 %v1900_v45 }
 0x147   :  { %2311 = vmatmul.mubr.msk.f32.gmra.mxu1 %vm784_vm2, %v2847_v51  ;;  %2354 = vmatmul.mubr.msk.f32.gmra.mxu0 %vm784_vm2, %v2909_v3 }
 0x148   :  { %2356 = vmatprep.mubr.msk.f32.mxu0 %vm784_vm2, %v2921_v7  ;;  %2313 = vmatprep.mubr.msk.f32.mxu1 %vm2435_vm1, %v2434_v0 }
 0x14b   :  { %2314 = vmatmul.mubr.msk.f32.gmra.mxu1 %vm784_vm2, %v2866_v28  ;;  %2357 = vmatmul.mubr.msk.f32.gmra.mxu0 %vm784_vm2, %v2933_v11 }
 0x14c   :  { %2359 = vmatprep.mubr.msk.f32.mxu0 %vm784_vm2, %v2945_v15  ;;  %2316 = vmatprep.mubr.msk.f32.mxu1 %vm2435_vm1, %v2434_v0 }
 0x14f   :  { %2317 = vmatmul.mubr.msk.f32.gmra.mxu1 %vm784_vm2, %v2885_v48  ;;  %2360 = vmatmul.mubr.msk.f32.gmra.mxu0 %vm784_vm2, %v2956_v19 }
 0x150   :  { %2362 = vmatprep.mubr.msk.f32.mxu0 %vm784_vm2, %v2965_v44  ;;  %2319 = vmatprep.mubr.msk.f32.mxu1 %vm2435_vm1, %v2434_v0 }
 0x153   :  { %2320 = vmatmul.mubr.msk.f32.gmra.mxu1 %vm784_vm2, %v2897_v63  ;;  %2363 = vmatmul.mubr.msk.f32.gmra.mxu0 %vm784_vm2, %v2974_v59 }
 0x154   :  { %2322 = vmatprep.mubr.msk.f32.mxu1 %vm2435_vm1, %v2434_v0  ;;  %2369 = vmatprep.mubr.msk.f32.mxu0 %vm2435_vm1, %v2434_v0 }
 0x157   :  { %2323 = vmatmul.mubr.msk.f32.gmra.mxu1 %vm784_vm2, %v2909_v3  ;;  %2370 = vmatmul.mubr.msk.f32.vlgmr.msra.gmra.mxu0 %vm784_vm2, %v2818_v56  ;;  %v3146_v56 = vld [vmem:[%s3539_s4] ss:$0 sm:$0xff] }
 0x158   :  { %2325 = vmatprep.mubr.msk.f32.mxu1 %vm2435_vm1, %v2434_v0  ;;  %2372 = vmatprep.mubr.msk.f32.mxu0 %vm2435_vm1, %v2434_v0 }
 0x15b   :  { %2326 = vmatmul.mubr.msk.f32.gmra.mxu1 %vm784_vm2, %v2921_v7  ;;  %2373 = vmatmul.mubr.msk.f32.gmra.mxu0 %vm784_vm2, %v2833_v47 }
 0x15c   :  { %2328 = vmatprep.mubr.msk.f32.mxu1 %vm2435_vm1, %v2434_v0  ;;  %2375 = vmatprep.mubr.msk.f32.mxu0 %vm2435_vm1, %v2434_v0 }
 0x15f   :  { %2329 = vmatmul.mubr.msk.f32.gmra.mxu1 %vm784_vm2, %v2933_v11  ;;  %2376 = vmatmul.mubr.msk.f32.gmra.mxu0 %vm784_vm2, %v2847_v51 }
 0x160   :  { %2331 = vmatprep.mubr.msk.f32.mxu1 %vm2435_vm1, %v2434_v0  ;;  %2378 = vmatprep.mubr.msk.f32.mxu0 %vm2435_vm1, %v2434_v0 }
 0x163   :  { %2332 = vmatmul.mubr.msk.f32.gmra.mxu1 %vm784_vm2, %v2945_v15  ;;  %2379 = vmatmul.mubr.msk.f32.gmra.mxu0 %vm784_vm2, %v2866_v28 }
 0x164   :  { %2334 = vmatprep.mubr.msk.f32.mxu1 %vm2435_vm1, %v2434_v0  ;;  %2381 = vmatprep.mubr.msk.f32.mxu0 %vm2435_vm1, %v2434_v0 }
 0x167   :  { %2335 = vmatmul.mubr.msk.f32.gmra.mxu1 %vm784_vm2, %v2956_v19  ;;  %2382 = vmatmul.mubr.msk.f32.gmra.mxu0 %vm784_vm2, %v2885_v48 }
 0x168   :  { %2337 = vmatprep.mubr.msk.f32.mxu1 %vm2435_vm1, %v2434_v0  ;;  %2384 = vmatprep.mubr.msk.f32.mxu0 %vm2435_vm1, %v2434_v0 }
 0x16b   :  { %2338 = vmatmul.mubr.msk.f32.gmra.mxu1 %vm784_vm2, %v2965_v44  ;;  %2385 = vmatmul.mubr.msk.f32.gmra.mxu0 %vm784_vm2, %v2897_v63 }
 0x16c   :  { %2340 = vmatprep.mubr.msk.f32.mxu1 %vm2435_vm1, %v2434_v0  ;;  %2387 = vmatprep.mubr.msk.f32.mxu0 %vm2435_vm1, %v2434_v0 }
 0x16f   :  { %2341 = vmatmul.mubr.msk.f32.gmra.mxu1 %vm784_vm2, %v2974_v59  ;;  %2388 = vmatmul.mubr.msk.f32.gmra.mxu0 %vm784_vm2, %v2909_v3 }
 0x170   :  { %2412 = vmatprep.mubr.msk.f32.mxu1 %vm784_vm2, %v2833_v47  ;;  %2390 = vmatprep.mubr.msk.f32.mxu0 %vm2435_vm1, %v2434_v0 }
 0x173   :  { %2391 = vmatmul.mubr.msk.f32.gmra.mxu0 %vm784_vm2, %v2921_v7  ;;  %2413 = vmatmul.mubr.msk.f32.vlgmr.msra.gmra.mxu1 %vm784_vm2, %v2847_v51 }
 0x174   :  { %2415 = vmatprep.mubr.msk.f32.mxu1 %vm784_vm2, %v2866_v28  ;;  %2393 = vmatprep.mubr.msk.f32.mxu0 %vm2435_vm1, %v2434_v0 }
 0x177   :  { %2394 = vmatmul.mubr.msk.f32.gmra.mxu0 %vm784_vm2, %v2933_v11  ;;  %2416 = vmatmul.mubr.msk.f32.gmra.mxu1 %vm784_vm2, %v2885_v48 }
 0x178   :  { %2418 = vmatprep.mubr.msk.f32.mxu1 %vm784_vm2, %v2897_v63  ;;  %2396 = vmatprep.mubr.msk.f32.mxu0 %vm2435_vm1, %v2434_v0 }
 0x17b   :  { %2397 = vmatmul.mubr.msk.f32.gmra.mxu0 %vm784_vm2, %v2945_v15  ;;  %2419 = vmatmul.mubr.msk.f32.gmra.mxu1 %vm784_vm2, %v2909_v3 }
 0x17c   :  { %2421 = vmatprep.mubr.msk.f32.mxu1 %vm784_vm2, %v2921_v7  ;;  %2399 = vmatprep.mubr.msk.f32.mxu0 %vm2435_vm1, %v2434_v0 }
 0x17f   :  { %2400 = vmatmul.mubr.msk.f32.gmra.mxu0 %vm784_vm2, %v2956_v19  ;;  %2422 = vmatmul.mubr.msk.f32.gmra.mxu1 %vm784_vm2, %v2933_v11 }
 0x180   :  { %2424 = vmatprep.mubr.msk.f32.mxu1 %vm784_vm2, %v2945_v15  ;;  %2402 = vmatprep.mubr.msk.f32.mxu0 %vm2435_vm1, %v2434_v0 }
 0x183   :  { %2403 = vmatmul.mubr.msk.f32.gmra.mxu0 %vm784_vm2, %v2965_v44  ;;  %2425 = vmatmul.mubr.msk.f32.gmra.mxu1 %vm784_vm2, %v2956_v19 }
 0x184   :  { %2427 = vmatprep.mubr.msk.f32.mxu1 %vm784_vm2, %v2965_v44  ;;  %2405 = vmatprep.mubr.msk.f32.mxu0 %vm2435_vm1, %v2434_v0 }
 0x187   :  { %2406 = vmatmul.mubr.msk.f32.gmra.mxu0 %vm784_vm2, %v2974_v59  ;;  %2428 = vmatmul.mubr.msk.f32.gmra.mxu1 %vm784_vm2, %v2974_v59 }
 0x1cb   :  { %v890_v47 = vpop.f32.mrf.mxu0 }
 0x1cc   :  { %v891_v51 = vadd.f32 %v3146_v56, %v890_v47  ;;  %v3268_v47 = vld [vmem:[%s3539_s4 + $0x1] ss:$0 sm:$0xff] }
 0x1cd   :  { %v2241_v28 = vpop.f32.mrf.mxu0 }
 0x1ce   :  { %954 = vst.msk [vmem:[%s3540_s7] sm:$0xff] %vm784_vm2, %v891_v51  ;;  %v3273_v51 = vld [vmem:[%s3541_s6 + $0x1] ss:$0 sm:$0xff] }
 0x1cf   :  { %v895_v0 = vpop.f32.mrf.mxu0 }
 0x1d0   :  { %v896_v32 = vadd.f32 %v3146_v56, %v895_v0 }
 0x1d1   :  { %v2244_v48 = vpop.f32.mrf.mxu0 }
 0x1d2   :  { %955 = vst.msk [vmem:[%s3540_s7 + $0x8] sm:$0xff] %vm784_vm2, %v896_v32 }
 0x1d3   :  { %v900_v52 = vpop.f32.mrf.mxu0  ;;  %v2284_v39 = vpop.f32.mrf.mxu1 }
 0x1d4   :  { %v901_v53 = vadd.f32 %v3146_v56, %v900_v52  ;;  %v1048_v57 = vadd.f32 %v2284_v39, %v3157_v49 }
 0x1d5   :  { %v2247_v60 = vpop.f32.mrf.mxu0  ;;  %v1042_v50 = vpop.f32.mrf.mxu1 }
 0x1d6   :  { %956 = vst.msk [vmem:[%s3540_s7 + $0x10] sm:$0xff] %vm784_vm2, %v901_v53  ;;  %v1043_v63 = vadd.f32 %v3157_v49, %v1042_v50 }
 0x1d7   :  { %1102 = vst.msk [vmem:[%s3542_s8 + $0x8] sm:$0xff] %vm45_vm0, %v1048_v57  ;;  %v905_v61 = vpop.f32.mrf.mxu0 }
 0x1d8   :  { %1101 = vst.msk [vmem:[%s3542_s8] sm:$0xff] %vm45_vm0, %v1043_v63  ;;  %v906_v36 = vadd.f32 %v3146_v56, %v905_v61 }
 0x1d9   :  { %v2250_v30 = vpop.f32.mrf.mxu0 }
 0x1da   :  { %957 = vst.msk [vmem:[%s3540_s7 + $0x18] sm:$0xff] %vm784_vm2, %v906_v36 }
 0x1db   :  { %v910_v43 = vpop.f32.mrf.mxu0  ;;  %v2287_v1 = vpop.f32.mrf.mxu1 }
 0x1dc   :  { %v911_v4 = vadd.f32 %v3146_v56, %v910_v43  ;;  %v1058_v54 = vadd.f32 %v2287_v1, %v3157_v49 }
 0x1dd   :  { %v2253_v3 = vpop.f32.mrf.mxu0  ;;  %v1052_v34 = vpop.f32.mrf.mxu1 }
 0x1de   :  { %958 = vst.msk [vmem:[%s3540_s7 + $0x20] sm:$0xff] %vm784_vm2, %v911_v4  ;;  %v1053_v5 = vadd.f32 %v3157_v49, %v1052_v34 }
 0x1df   :  { %1104 = vst.msk [vmem:[%s3542_s8 + $0x18] sm:$0xff] %vm45_vm0, %v1058_v54  ;;  %v915_v26 = vpop.f32.mrf.mxu0 }
 0x1e0   :  { %1103 = vst.msk [vmem:[%s3542_s8 + $0x10] sm:$0xff] %vm45_vm0, %v1053_v5  ;;  %v916_v6 = vadd.f32 %v3146_v56, %v915_v26 }
 0x1e1   :  { %v2256_v8 = vpop.f32.mrf.mxu0 }
 0x1e2   :  { %959 = vst.msk [vmem:[%s3540_s7 + $0x28] sm:$0xff] %vm784_vm2, %v916_v6 }
 0x1e3   :  { %v920_v58 = vpop.f32.mrf.mxu0  ;;  %v2290_v7 = vpop.f32.mrf.mxu1 }
 0x1e4   :  { %v921_v9 = vadd.f32 %v3146_v56, %v920_v58  ;;  %v1068_v10 = vadd.f32 %v2290_v7, %v3157_v49 }
 0x1e5   :  { %v2259_v2 = vpop.f32.mrf.mxu0  ;;  %v1062_v12 = vpop.f32.mrf.mxu1 }
 0x1e6   :  { %960 = vst.msk [vmem:[%s3540_s7 + $0x30] sm:$0xff] %vm784_vm2, %v921_v9  ;;  %v1063_v38 = vadd.f32 %v3157_v49, %v1062_v12 }
 0x1e7   :  { %1106 = vst.msk [vmem:[%s3542_s8 + $0x28] sm:$0xff] %vm45_vm0, %v1068_v10  ;;  %v925_v62 = vpop.f32.mrf.mxu0 }
 0x1e8   :  { %1105 = vst.msk [vmem:[%s3542_s8 + $0x20] sm:$0xff] %vm45_vm0, %v1063_v38  ;;  %v926_v11 = vadd.f32 %v3146_v56, %v925_v62 }
 0x1e9   :  { %v2262_v13 = vpop.f32.mrf.mxu0 }
 0x1ea   :  { %961 = vst.msk [vmem:[%s3540_s7 + $0x38] sm:$0xff] %vm784_vm2, %v926_v11 }
 0x1eb   :  { %v930_v14 = vpop.f32.mrf.mxu0  ;;  %v2293_v25 = vpop.f32.mrf.mxu1 }
 0x1ec   :  { %v931_v16 = vadd.f32 %v3146_v56, %v930_v14  ;;  %v1078_v17 = vadd.f32 %v2293_v25, %v3157_v49 }
 0x1ed   :  { %v2265_v27 = vpop.f32.mrf.mxu0  ;;  %v1072_v15 = vpop.f32.mrf.mxu1 }
 0x1ee   :  { %962 = vst.msk [vmem:[%s3540_s7 + $0x40] sm:$0xff] %vm784_vm2, %v931_v16  ;;  %v1073_v18 = vadd.f32 %v3157_v49, %v1072_v15 }
 0x1ef   :  { %1108 = vst.msk [vmem:[%s3542_s8 + $0x38] sm:$0xff] %vm45_vm0, %v1078_v17  ;;  %v935_v21 = vpop.f32.mrf.mxu0 }
 0x1f0   :  { %1107 = vst.msk [vmem:[%s3542_s8 + $0x30] sm:$0xff] %vm45_vm0, %v1073_v18  ;;  %v936_v42 = vadd.f32 %v3146_v56, %v935_v21  ;;  %v3368_v18 = vld [vmem:[%s3539_s4 + $0x2] ss:$0 sm:$0xff] }
 0x1f1   :  { %v2268_v55 = vpop.f32.mrf.mxu0 }
 0x1f2   :  { %963 = vst.msk [vmem:[%s3540_s7 + $0x48] sm:$0xff] %vm784_vm2, %v936_v42 }
 0x1f3   :  { %v940_v22 = vpop.f32.mrf.mxu0  ;;  %v2296_v31 = vpop.f32.mrf.mxu1 }
 0x1f4   :  { %v941_v19 = vadd.f32 %v3146_v56, %v940_v22  ;;  %v1088_v20 = vadd.f32 %v2296_v31, %v3157_v49 }
 0x1f5   :  { %v2271_v29 = vpop.f32.mrf.mxu0  ;;  %v1082_v33 = vpop.f32.mrf.mxu1 }
 0x1f6   :  { %964 = vst.msk [vmem:[%s3540_s7 + $0x50] sm:$0xff] %vm784_vm2, %v941_v19  ;;  %v1083_v37 = vadd.f32 %v3157_v49, %v1082_v33 }
 0x1f7   :  { %1110 = vst.msk [vmem:[%s3542_s8 + $0x48] sm:$0xff] %vm45_vm0, %v1088_v20  ;;  %v945_v41 = vpop.f32.mrf.mxu0 }
 0x1f8   :  { %1109 = vst.msk [vmem:[%s3542_s8 + $0x40] sm:$0xff] %vm45_vm0, %v1083_v37  ;;  %v946_v44 = vadd.f32 %v3146_v56, %v945_v41 }
 0x1f9   :  { %v2274_v35 = vpop.f32.mrf.mxu0 }
 0x1fa   :  { %965 = vst.msk [vmem:[%s3540_s7 + $0x58] sm:$0xff] %vm784_vm2, %v946_v44 }
 0x1fb   :  { %v950_v23 = vpop.f32.mrf.mxu0  ;;  %v2299_v46 = vpop.f32.mrf.mxu1 }
 0x1fc   :  { %v951_v59 = vadd.f32 %v3146_v56, %v950_v23  ;;  %v1098_v40 = vadd.f32 %v2299_v46, %v3157_v49 }
 0x1fd   :  { %v2277_v45 = vpop.f32.mrf.mxu0  ;;  %v1092_v24 = vpop.f32.mrf.mxu1 }
 0x1fe   :  { %966 = vst.msk [vmem:[%s3540_s7 + $0x60] sm:$0xff] %vm784_vm2, %v951_v59  ;;  %v1093_v56 = vadd.f32 %v3157_v49, %v1092_v24 }
 0x1ff   :  { %1112 = vst.msk [vmem:[%s3542_s8 + $0x58] sm:$0xff] %vm45_vm0, %v1098_v40  ;;  %v1190_v28 = vpop.f32.mrf.mxu1  ;;  %v2349_v0 = vpop.f32.mrf.mxu0 }
 0x200   :  { %1111 = vst.msk [vmem:[%s3542_s8 + $0x50] sm:$0xff] %vm45_vm0, %v1093_v56  ;;  %v1191_v32 = vadd.f32 %v3268_v47, %v1190_v28  ;;  %v1351_v48 = vadd.f32 %v2349_v0, %v3273_v51 }
 0x201   :  { %v2306_v52 = vpop.f32.mrf.mxu1  ;;  %v1345_v39 = vpop.f32.mrf.mxu0 }
 0x202   :  { %1829 = vst.msk [vmem:[%s3540_s7 + $0x68] sm:$0xff] %vm784_vm2, %v1191_v32  ;;  %v1346_v49 = vadd.f32 %v3273_v51, %v1345_v39 }
 0x203   :  { %1859 = vst.msk [vmem:[%s3542_s8 + $0x68] sm:$0xff] %vm45_vm0, %v1351_v48  ;;  %v1195_v53 = vpop.f32.mrf.mxu1  ;;  %v2352_v57 = vpop.f32.mrf.mxu0 }
 0x204   :  { %1858 = vst.msk [vmem:[%s3542_s8 + $0x60] sm:$0xff] %vm45_vm0, %v1346_v49  ;;  %v1196_v60 = vadd.f32 %v3268_v47, %v1195_v53  ;;  %v1361_v50 = vadd.f32 %v2352_v57, %v3273_v51 }
 0x205   :  { %v2309_v63 = vpop.f32.mrf.mxu1  ;;  %v1355_v61 = vpop.f32.mrf.mxu0 }
 0x206   :  { %1830 = vst.msk [vmem:[%s3540_s7 + $0x70] sm:$0xff] %vm784_vm2, %v1196_v60  ;;  %v1356_v36 = vadd.f32 %v3273_v51, %v1355_v61 }
 0x207   :  { %1861 = vst.msk [vmem:[%s3542_s8 + $0x78] sm:$0xff] %vm45_vm0, %v1361_v50  ;;  %v1200_v30 = vpop.f32.mrf.mxu1  ;;  %v2355_v43 = vpop.f32.mrf.mxu0 }
 0x208   :  { %1860 = vst.msk [vmem:[%s3542_s8 + $0x70] sm:$0xff] %vm45_vm0, %v1356_v36  ;;  %v1201_v1 = vadd.f32 %v3268_v47, %v1200_v30  ;;  %v1371_v4 = vadd.f32 %v2355_v43, %v3273_v51 }
 0x209   :  { %v2312_v54 = vpop.f32.mrf.mxu1  ;;  %v1365_v3 = vpop.f32.mrf.mxu0 }
 0x20a   :  { %1831 = vst.msk [vmem:[%s3540_s7 + $0x78] sm:$0xff] %vm784_vm2, %v1201_v1  ;;  %v1366_v34 = vadd.f32 %v3273_v51, %v1365_v3 }
 0x20b   :  { %1863 = vst.msk [vmem:[%s3542_s8 + $0x88] sm:$0xff] %vm45_vm0, %v1371_v4  ;;  %v1205_v5 = vpop.f32.mrf.mxu1  ;;  %v2358_v26 = vpop.f32.mrf.mxu0 }
 0x20c   :  { %1862 = vst.msk [vmem:[%s3542_s8 + $0x80] sm:$0xff] %vm45_vm0, %v1366_v34  ;;  %v1206_v6 = vadd.f32 %v3268_v47, %v1205_v5  ;;  %v1381_v8 = vadd.f32 %v2358_v26, %v3273_v51  ;;  %v1903_v26 = vld [vmem:[%s3541_s6 + $0x2] ss:$0 sm:$0xff] }
 0x20d   :  { %v2315_v58 = vpop.f32.mrf.mxu1  ;;  %v1375_v7 = vpop.f32.mrf.mxu0 }
 0x20e   :  { %1832 = vst.msk [vmem:[%s3540_s7 + $0x80] sm:$0xff] %vm784_vm2, %v1206_v6  ;;  %v1376_v9 = vadd.f32 %v3273_v51, %v1375_v7 }
 0x20f   :  { %1865 = vst.msk [vmem:[%s3542_s8 + $0x98] sm:$0xff] %vm45_vm0, %v1381_v8  ;;  %v1210_v10 = vpop.f32.mrf.mxu1  ;;  %v2361_v2 = vpop.f32.mrf.mxu0 }
 0x210   :  { %1864 = vst.msk [vmem:[%s3542_s8 + $0x90] sm:$0xff] %vm45_vm0, %v1376_v9  ;;  %v1211_v12 = vadd.f32 %v3268_v47, %v1210_v10  ;;  %v1391_v38 = vadd.f32 %v2361_v2, %v3273_v51 }
 0x211   :  { %v2318_v62 = vpop.f32.mrf.mxu1  ;;  %v1385_v11 = vpop.f32.mrf.mxu0 }
 0x212   :  { %1833 = vst.msk [vmem:[%s3540_s7 + $0x88] sm:$0xff] %vm784_vm2, %v1211_v12  ;;  %v1386_v13 = vadd.f32 %v3273_v51, %v1385_v11 }
 0x213   :  { %1867 = vst.msk [vmem:[%s3542_s8 + $0xa8] sm:$0xff] %vm45_vm0, %v1391_v38  ;;  %v1215_v14 = vpop.f32.mrf.mxu1  ;;  %v2364_v25 = vpop.f32.mrf.mxu0 }
 0x214   :  { %1866 = vst.msk [vmem:[%s3542_s8 + $0xa0] sm:$0xff] %vm45_vm0, %v1386_v13  ;;  %v1216_v16 = vadd.f32 %v3268_v47, %v1215_v14  ;;  %v1401_v17 = vadd.f32 %v2364_v25, %v3273_v51 }
 0x215   :  { %v2321_v27 = vpop.f32.mrf.mxu1  ;;  %v1395_v15 = vpop.f32.mrf.mxu0 }
 0x216   :  { %1834 = vst.msk [vmem:[%s3540_s7 + $0x90] sm:$0xff] %vm784_vm2, %v1216_v16  ;;  %v1396_v21 = vadd.f32 %v3273_v51, %v1395_v15 }
 0x217   :  { %1869 = vst.msk [vmem:[%s3542_s8 + $0xb8] sm:$0xff] %vm45_vm0, %v1401_v17  ;;  %v1220_v42 = vpop.f32.mrf.mxu1  ;;  %v1494_v55 = vpop.f32.mrf.mxu0 }
 0x218   :  { %1868 = vst.msk [vmem:[%s3542_s8 + $0xb0] sm:$0xff] %vm45_vm0, %v1396_v21  ;;  %v1221_v22 = vadd.f32 %v3268_v47, %v1220_v42  ;;  %v1495_v31 = vadd.f32 %v3368_v18, %v1494_v55 }
 0x219   :  { %v2324_v19 = vpop.f32.mrf.mxu1  ;;  %v2371_v20 = vpop.f32.mrf.mxu0 }
 0x21a   :  { %1835 = vst.msk [vmem:[%s3540_s7 + $0x98] sm:$0xff] %vm784_vm2, %v1221_v22  ;;  %1887 = vst.msk [vmem:[%s3540_s7 + $0xd0] sm:$0xff] %vm784_vm2, %v1495_v31 }
 0x21b   :  { %v1225_v29 = vpop.f32.mrf.mxu1  ;;  %v1499_v33 = vpop.f32.mrf.mxu0 }
 0x21c   :  { %v1226_v37 = vadd.f32 %v3268_v47, %v1225_v29  ;;  %v1500_v41 = vadd.f32 %v3368_v18, %v1499_v33 }
 0x21d   :  { %v2327_v44 = vpop.f32.mrf.mxu1  ;;  %v2374_v35 = vpop.f32.mrf.mxu0 }
 0x21e   :  { %1836 = vst.msk [vmem:[%s3540_s7 + $0xa0] sm:$0xff] %vm784_vm2, %v1226_v37  ;;  %1888 = vst.msk [vmem:[%s3540_s7 + $0xd8] sm:$0xff] %vm784_vm2, %v1500_v41 }
 0x21f   :  { %v1230_v23 = vpop.f32.mrf.mxu1  ;;  %v1504_v46 = vpop.f32.mrf.mxu0 }
 0x220   :  { %v1231_v59 = vadd.f32 %v3268_v47, %v1230_v23  ;;  %v1505_v40 = vadd.f32 %v3368_v18, %v1504_v46 }
 0x221   :  { %v2330_v45 = vpop.f32.mrf.mxu1  ;;  %v2377_v24 = vpop.f32.mrf.mxu0 }
 0x222   :  { %1837 = vst.msk [vmem:[%s3540_s7 + $0xa8] sm:$0xff] %vm784_vm2, %v1231_v59  ;;  %1889 = vst.msk [vmem:[%s3540_s7 + $0xe0] sm:$0xff] %vm784_vm2, %v1505_v40 }
 0x223   :  { %v1235_v51 = vpop.f32.mrf.mxu1  ;;  %v1509_v56 = vpop.f32.mrf.mxu0 }
 0x224   :  { %v1236_v28 = vadd.f32 %v3268_v47, %v1235_v51  ;;  %v1510_v0 = vadd.f32 %v3368_v18, %v1509_v56 }
 0x225   :  { %v2333_v32 = vpop.f32.mrf.mxu1  ;;  %v2380_v48 = vpop.f32.mrf.mxu0 }
 0x226   :  { %1838 = vst.msk [vmem:[%s3540_s7 + $0xb0] sm:$0xff] %vm784_vm2, %v1236_v28  ;;  %1890 = vst.msk [vmem:[%s3540_s7 + $0xe8] sm:$0xff] %vm784_vm2, %v1510_v0 }
 0x227   :  { %v1240_v52 = vpop.f32.mrf.mxu1  ;;  %v1514_v39 = vpop.f32.mrf.mxu0 }
 0x228   :  { %v1241_v49 = vadd.f32 %v3268_v47, %v1240_v52  ;;  %v1515_v53 = vadd.f32 %v3368_v18, %v1514_v39 }
 0x229   :  { %v2336_v57 = vpop.f32.mrf.mxu1  ;;  %v2383_v60 = vpop.f32.mrf.mxu0 }
 0x22a   :  { %1839 = vst.msk [vmem:[%s3540_s7 + $0xb8] sm:$0xff] %vm784_vm2, %v1241_v49  ;;  %1891 = vst.msk [vmem:[%s3540_s7 + $0xf0] sm:$0xff] %vm784_vm2, %v1515_v53 }
 0x22b   :  { %v1245_v50 = vpop.f32.mrf.mxu1  ;;  %v1519_v63 = vpop.f32.mrf.mxu0 }
 0x22c   :  { %v1246_v61 = vadd.f32 %v3268_v47, %v1245_v50  ;;  %v1520_v36 = vadd.f32 %v3368_v18, %v1519_v63 }
 0x22d   :  { %v2339_v30 = vpop.f32.mrf.mxu1  ;;  %v2386_v43 = vpop.f32.mrf.mxu0 }
 0x22e   :  { %1840 = vst.msk [vmem:[%s3540_s7 + $0xc0] sm:$0xff] %vm784_vm2, %v1246_v61  ;;  %1892 = vst.msk [vmem:[%s3540_s7 + $0xf8] sm:$0xff] %vm784_vm2, %v1520_v36 }
 0x22f   :  { %v1250_v1 = vpop.f32.mrf.mxu1  ;;  %v1524_v4 = vpop.f32.mrf.mxu0 }
 0x230   :  { %v1251_v54 = vadd.f32 %v3268_v47, %v1250_v1  ;;  %v1525_v3 = vadd.f32 %v3368_v18, %v1524_v4 }
 0x231   :  { %v2342_v34 = vpop.f32.mrf.mxu1  ;;  %v2389_v5 = vpop.f32.mrf.mxu0 }
 0x232   :  { %1841 = vst.msk [vmem:[%s3540_s7 + $0xc8] sm:$0xff] %vm784_vm2, %v1251_v54  ;;  %1893 = vst.msk [vmem:[%s3540_s7 + $0x100] sm:$0xff] %vm784_vm2, %v1525_v3 }
 0x233   :  { %v1529_v6 = vpop.f32.mrf.mxu0  ;;  %v2414_v47 = vpop.f32.mrf.mxu1 }
 0x234   :  { %v1530_v8 = vadd.f32 %v3368_v18, %v1529_v6  ;;  %v1655_v58 = vadd.f32 %v2414_v47, %v1903_v26 }
 0x235   :  { %v2392_v7 = vpop.f32.mrf.mxu0  ;;  %v1649_v9 = vpop.f32.mrf.mxu1 }
 0x236   :  { %1894 = vst.msk [vmem:[%s3540_s7 + $0x108] sm:$0xff] %vm784_vm2, %v1530_v8  ;;  %v1650_v10 = vadd.f32 %v1903_v26, %v1649_v9 }
 0x237   :  { %1917 = vst.msk [vmem:[%s3542_s8 + $0xc8] sm:$0xff] %vm45_vm0, %v1655_v58  ;;  %v1534_v2 = vpop.f32.mrf.mxu0  ;;  %v2417_v12 = vpop.f32.mrf.mxu1 }
 0x238   :  { %1916 = vst.msk [vmem:[%s3542_s8 + $0xc0] sm:$0xff] %vm45_vm0, %v1650_v10  ;;  %v1535_v38 = vadd.f32 %v3368_v18, %v1534_v2  ;;  %v1665_v62 = vadd.f32 %v2417_v12, %v1903_v26 }
 0x239   :  { %v2395_v11 = vpop.f32.mrf.mxu0  ;;  %v1659_v13 = vpop.f32.mrf.mxu1 }
 0x23a   :  { %1895 = vst.msk [vmem:[%s3540_s7 + $0x110] sm:$0xff] %vm784_vm2, %v1535_v38  ;;  %v1660_v14 = vadd.f32 %v1903_v26, %v1659_v13 }
 0x23b   :  { %1919 = vst.msk [vmem:[%s3542_s8 + $0xd8] sm:$0xff] %vm45_vm0, %v1665_v62  ;;  %v1539_v25 = vpop.f32.mrf.mxu0  ;;  %v2420_v16 = vpop.f32.mrf.mxu1 }
 0x23c   :  { %1918 = vst.msk [vmem:[%s3542_s8 + $0xd0] sm:$0xff] %vm45_vm0, %v1660_v14  ;;  %v1540_v17 = vadd.f32 %v3368_v18, %v1539_v25  ;;  %v1675_v27 = vadd.f32 %v2420_v16, %v1903_v26 }
 0x23d   :  { %v2398_v15 = vpop.f32.mrf.mxu0  ;;  %v1669_v21 = vpop.f32.mrf.mxu1 }
 0x23e   :  { %1896 = vst.msk [vmem:[%s3540_s7 + $0x118] sm:$0xff] %vm784_vm2, %v1540_v17  ;;  %v1670_v42 = vadd.f32 %v1903_v26, %v1669_v21 }
 0x23f   :  { %1921 = vst.msk [vmem:[%s3542_s8 + $0xe8] sm:$0xff] %vm45_vm0, %v1675_v27  ;;  %v1544_v55 = vpop.f32.mrf.mxu0  ;;  %v2423_v22 = vpop.f32.mrf.mxu1 }
 0x240   :  { %1920 = vst.msk [vmem:[%s3542_s8 + $0xe0] sm:$0xff] %vm45_vm0, %v1670_v42  ;;  %v1545_v31 = vadd.f32 %v3368_v18, %v1544_v55  ;;  %v1685_v19 = vadd.f32 %v2423_v22, %v1903_v26 }
 0x241   :  { %v2401_v20 = vpop.f32.mrf.mxu0  ;;  %v1679_v29 = vpop.f32.mrf.mxu1 }
 0x242   :  { %1897 = vst.msk [vmem:[%s3540_s7 + $0x120] sm:$0xff] %vm784_vm2, %v1545_v31  ;;  %v1680_v33 = vadd.f32 %v1903_v26, %v1679_v29 }
 0x243   :  { %1923 = vst.msk [vmem:[%s3542_s8 + $0xf8] sm:$0xff] %vm45_vm0, %v1685_v19  ;;  %v1549_v37 = vpop.f32.mrf.mxu0  ;;  %v2426_v41 = vpop.f32.mrf.mxu1 }
 0x244   :  { %1922 = vst.msk [vmem:[%s3542_s8 + $0xf0] sm:$0xff] %vm45_vm0, %v1680_v33  ;;  %v1550_v44 = vadd.f32 %v3368_v18, %v1549_v37  ;;  %v1695_v35 = vadd.f32 %v2426_v41, %v1903_v26 }
 0x245   :  { %v2404_v23 = vpop.f32.mrf.mxu0  ;;  %v1689_v46 = vpop.f32.mrf.mxu1 }
 0x246   :  { %1898 = vst.msk [vmem:[%s3540_s7 + $0x128] sm:$0xff] %vm784_vm2, %v1550_v44  ;;  %v1690_v59 = vadd.f32 %v1903_v26, %v1689_v46 }
 0x247   :  { %1925 = vst.msk [vmem:[%s3542_s8 + $0x108] sm:$0xff] %vm45_vm0, %v1695_v35  ;;  %v1554_v40 = vpop.f32.mrf.mxu0  ;;  %v2429_v45 = vpop.f32.mrf.mxu1 }
 0x248   :  { %1924 = vst.msk [vmem:[%s3542_s8 + $0x100] sm:$0xff] %vm45_vm0, %v1690_v59  ;;  %v1555_v24 = vadd.f32 %v3368_v18, %v1554_v40  ;;  %v1705_v51 = vadd.f32 %v2429_v45, %v1903_v26 }
 0x249   :  { %v2407_v56 = vpop.f32.mrf.mxu0  ;;  %v1699_v28 = vpop.f32.mrf.mxu1 }
 0x24a   :  { %1899 = vst.msk [vmem:[%s3540_s7 + $0x130] sm:$0xff] %vm784_vm2, %v1555_v24  ;;  %v1700_v0 = vadd.f32 %v1903_v26, %v1699_v28 }
 0x24b   :  { %1927 = vst.msk [vmem:[%s3542_s8 + $0x118] sm:$0xff] %vm45_vm0, %v1705_v51 }
 0x24c   :  { %1926 = vst.msk [vmem:[%s3542_s8 + $0x110] sm:$0xff] %vm45_vm0, %v1700_v0 }

</bundles_post_ra>
